<compile_context>
chip_gen: v7x
topology: tpu7x:2x2x1
jax: 0.10.0
libtpu: 0.0.40
codegen_flags: <defaults>
</compile_context>

<pallas_src>
import functools

import jax
import jax.numpy as jnp
from jax.experimental import pallas as pl
from jax.experimental.pallas import tpu as pltpu


def _round_up(x, m):
    return (x + m - 1) // m * m


def _padded_bytes(shape, dtype):
    """VMEM footprint of an array padded to the (sublane, 128-lane) layout."""
    itemsize = jnp.dtype(dtype).itemsize
    dims = list(shape) if len(shape) else [1]
    dims[-1] = _round_up(dims[-1], 128)
    if len(dims) >= 2:
        sub = max(8, 32 // itemsize)          # 8 for 32-bit, 16 for bf16, ...
        dims[-2] = _round_up(dims[-2], sub)
    total = itemsize
    for d in dims:
        total *= d
    return total


def _score_kernel(hid_ref, rid_ref, tid_ref, ent_ref, rel_ref, out_ref,
                  *, use_rel, ent_chunk):
    """Scores one tile of TB triples.

    hid/rid/tid_ref: (1, 1, TB) int32 triple ids for this tile.
    ent_ref:         (E, size)  entity table, VMEM resident.
    rel_ref:         (R, size)  relation table, VMEM resident.
    out_ref:         (1, 1, TB) f32 per-triple L2 scores (lane-dense block).
    """
    tb = hid_ref.shape[-1]
    num_ent, size = ent_ref.shape
    num_rel = rel_ref.shape[0]
    tdtype = ent_ref.dtype

    hid = hid_ref[0]                           # (1, TB) int32
    tid = tid_ref[0]                           # (1, TB) int32

    # One iota per tile, reused for head/tail (signed indicator), the remainder
    # chunk (sliced) and the relation gather (sliced when it fits).
    base_iota = jax.lax.broadcasted_iota(jnp.int32, (ent_chunk, tb), 0)

    def signed_partial(tbl, row_ids):
        # tbl: (c, size); row_ids: (c, TB) absolute entity row indices.
        # NOTE: ids outside [0, E) simply never match -> contribute zero
        # (unlike nn.Embedding, which would raise).
        ind = ((row_ids == hid).astype(tdtype)
               - (row_ids == tid).astype(tdtype))          # (c, TB) in {0,+-1}
        # Contract the row axis of BOTH operands: (c, size)^T @ (c, TB)
        #   -> (size, TB), accumulated in f32 on the MXU.
        return jax.lax.dot_general(tbl, ind, (((0,), (0,)), ((), ())),
                                   preferred_element_type=jnp.float32)

    num_full = num_ent // ent_chunk
    rem = num_ent - num_full * ent_chunk

    d = jnp.zeros((size, tb), jnp.float32)
    if num_full == 1:
        d = d + signed_partial(ent_ref[0:ent_chunk, :], base_iota)
    elif num_full > 1:
        def body(ci, acc):
            start = pl.multiple_of(ci * ent_chunk, ent_chunk)
            tbl = ent_ref[pl.ds(start, ent_chunk), :]
            return acc + signed_partial(tbl, base_iota + start)
        d = jax.lax.fori_loop(0, num_full, body, d)
    if rem > 0:
        start = num_full * ent_chunk
        d = d + signed_partial(ent_ref[start:num_ent, :],
                               base_iota[:rem] + start)

    if use_rel:
        rid = rid_ref[0]                        # (1, TB)
        if num_rel <= ent_chunk:
            iota_r = base_iota[:num_rel]
        else:
            iota_r = jax.lax.broadcasted_iota(jnp.int32, (num_rel, tb), 0)
        ind_r = (iota_r == rid).astype(rel_ref.dtype)       # (R, TB)
        d = d + jax.lax.dot_general(rel_ref[...], ind_r, (((0,), (0,)), ((), ())),
                                    preferred_element_type=jnp.float32)

    sq = jnp.sum(d * d, axis=0, keepdims=True)  # sublane reduce -> (1, TB)
    out_ref[0] = jnp.sqrt(sq)


def rb_retrofit_scores(entity_weights, rel_weights,
                       head_ids, rel_ids, tail_ids,
                       score_func="transE", tile=1024, ent_chunk=512):
    """Compute per-triple scores.

    entity_weights: (num_entities, size) f32 or bf16 (pre-cast outside hot path)
    rel_weights:    (num_rels,     size) f32 or bf16
    head_ids / rel_ids / tail_ids: (N,) integer ids
    score_func: "transE" -> ||h + r - t||_2 ; "no_rel" -> ||h - t||_2
    returns: (N, 1) f32
    """
    if score_func not in ("transE", "no_rel"):
        raise ValueError(f"unknown score_func: {score_func!r}")
    use_rel = score_func == "transE"

    entity_weights = jnp.asarray(entity_weights)
    rel_weights = jnp.asarray(rel_weights)
    num_ent, size = entity_weights.shape
    num_rel = rel_weights.shape[0]

    assert tile % 128 == 0
    n = head_ids.shape[0]
    tb = min(tile, _round_up(n, 128))
    pad_n = _round_up(n, tb)
    num_tiles = pad_n // tb

    # Entity-axis chunk for the indicator matmul (bounds the one-hot temporary).
    ent_chunk = min(ent_chunk, num_ent)
    if ent_chunk < num_ent:
        ent_chunk = max(8, ent_chunk // 8 * 8)

    def prep_ids(ids):
        ids = jnp.asarray(ids, jnp.int32)
        ids = jnp.pad(ids, (0, pad_n - n))      # pad with id 0; scores discarded
        return ids.reshape(num_tiles, 1, tb)

    hid, rid, tid = prep_ids(head_ids), prep_ids(rel_ids), prep_ids(tail_ids)

    kernel = functools.partial(_score_kernel, use_rel=use_rel,
                               ent_chunk=ent_chunk)

    def build(single_buffer_tables):
        table_kwargs = (dict(pipeline_mode=pl.Buffered(1))
                        if single_buffer_tables else {})
        id_spec = pl.BlockSpec((1, 1, tb), lambda i: (i, 0, 0))
        in_specs = [
            id_spec, id_spec, id_spec,
            pl.BlockSpec((num_ent, size), lambda i: (0, 0), **table_kwargs),
            pl.BlockSpec((num_rel, size), lambda i: (0, 0), **table_kwargs),
        ]
        out_spec = pl.BlockSpec((1, 1, tb), lambda i: (i, 0, 0))

        # VMEM budget: resident tables + id/output pipeline buffers + bounded
        # indicator chunk + accumulators, with 25% headroom, capped per chip.
        bufs = 1 if single_buffer_tables else 2
        tables = bufs * (_padded_bytes((num_ent, size), entity_weights.dtype)
                         + _padded_bytes((num_rel, size), rel_weights.dtype))
        ids_b = 3 * 2 * _padded_bytes((1, 1, tb), jnp.int32)
        out_b = 2 * _padded_bytes((1, 1, tb), jnp.float32)
        work = (3 * _padded_bytes((ent_chunk, tb), jnp.int32)
                + 3 * _padded_bytes((size, tb), jnp.float32))
        budget = int(1.25 * (tables + ids_b + out_b + work)) + (2 << 20)
        try:
            phys = int(getattr(pltpu.get_tpu_info(), "vmem_capacity_bytes", 0))
        except Exception:
            phys = 0
        phys = phys or (64 << 20)               # conservative (v7x) fallback
        cap = min(phys * 3 // 4, 112 << 20)
        vmem_limit = int(min(max(budget, 16 << 20), cap))

        return pl.pallas_call(
            kernel,
            out_shape=jax.ShapeDtypeStruct((num_tiles, 1, tb), jnp.float32),
            grid_spec=pltpu.PrefetchScalarGridSpec(
                num_scalar_prefetch=0,
                grid=(num_tiles,),
                in_specs=in_specs,
                out_specs=out_spec,
            ),
            compiler_params=pltpu.CompilerParams(
                dimension_semantics=("parallel",),
                vmem_limit_bytes=vmem_limit,
            ),
        )

    try:
        out = build(True)(hid, rid, tid, entity_weights, rel_weights)
    except Exception:
        # pl.Buffered(1) not supported by this Pallas build -> default buffers.
        out = build(False)(hid, rid, tid, entity_weights, rel_weights)

    return out.reshape(pad_n)[:n].reshape(n, 1)


def _reference(entity_weights, rel_weights, head_ids, rel_ids, tail_ids,
               score_func="transE"):
    ent = jnp.asarray(entity_weights, jnp.float32)
    rel = jnp.asarray(rel_weights, jnp.float32)
    h, r, t = ent[head_ids], rel[rel_ids], ent[tail_ids]
    d = h + r - t if score_func == "transE" else h - t
    return jnp.sqrt(jnp.sum(d * d, axis=-1, keepdims=True))


if __name__ == "__main__":
    key = jax.random.PRNGKey(0)
    k_ent, k_rel, k_h, k_r, k_t = jax.random.split(key, 5)

    num_entities = 600      # > ent_chunk below -> exercises the chunked gather
    num_rels = 40
    size = 32               # embedding size
    n_triples = 300

    entity_weights = jax.random.normal(k_ent, (num_entities, size), jnp.float32)
    rel_weights = jax.random.normal(k_rel, (num_rels, size), jnp.float32)
    head_ids = jax.random.randint(k_h, (n_triples,), 0, num_entities, jnp.int32)
    rel_ids = jax.random.randint(k_r, (n_triples,), 0, num_rels, jnp.int32)
    tail_ids = jax.random.randint(k_t, (n_triples,), 0, num_entities, jnp.int32)

    # transE, f32: multi-tile grid (3 tiles of 128) + chunked entity axis
    # (2 full 256-row chunks + an 88-row remainder).
    scores = jax.block_until_ready(
        rb_retrofit_scores(entity_weights, rel_weights,
                           head_ids, rel_ids, tail_ids,
                           score_func="transE", tile=128, ent_chunk=256))
    ref = _reference(entity_weights, rel_weights, head_ids, rel_ids, tail_ids,
                     "transE")
    assert scores.shape == (n_triples, 1)
    assert jnp.allclose(scores, ref, atol=1e-4, rtol=1e-4), (scores, ref)

    # no_rel, single tile (default tile size), single full chunk + remainder.
    scores_nr = jax.block_until_ready(
        rb_retrofit_scores(entity_weights, rel_weights,
                           head_ids, rel_ids, tail_ids, score_func="no_rel"))
    ref_nr = _reference(entity_weights, rel_weights, head_ids, rel_ids,
                        tail_ids, "no_rel")
    assert jnp.allclose(scores_nr, ref_nr, atol=1e-4, rtol=1e-4)

    # bf16-resident tables (pre-cast ONCE outside the hot path); indicator is
    # exact in bf16 and accumulation stays f32 -> only embedding rounding error.
    scores_bf = jax.block_until_ready(
        rb_retrofit_scores(entity_weights.astype(jnp.bfloat16),
                           rel_weights.astype(jnp.bfloat16),
                           head_ids, rel_ids, tail_ids, score_func="transE"))
    assert jnp.allclose(scores_bf, ref, atol=5e-2, rtol=5e-2)

    print("KERNEL_OK")
</pallas_src>

<mosaic_0001>
module attributes {stable_mosaic.version = 11 : i64} {
  func.func @_score_kernel(%arg0: i32, %arg1: memref<1x1x128xi32, #tpu.memory_space<vmem>>, %arg2: memref<1x1x128xi32, #tpu.memory_space<vmem>>, %arg3: memref<1x1x128xi32, #tpu.memory_space<vmem>>, %arg4: memref<600x32xf32, #tpu.memory_space<vmem>>, %arg5: memref<40x32xf32, #tpu.memory_space<vmem>>, %arg6: memref<1x1x128xf32, #tpu.memory_space<vmem>>) attributes {dimension_semantics = [#tpu.dimension_semantics<parallel>], iteration_bounds = array<i64: 3>, scalar_prefetch = 0 : i64, scratch_operands = 0 : i64, tpu.core_type = #tpu.core_type<tc>, window_params = [{transform_indices = @transform_0, window_bounds = array<i64: 1, 1, 128>}, {transform_indices = @transform_1, window_bounds = array<i64: 1, 1, 128>}, {transform_indices = @transform_2, window_bounds = array<i64: 1, 1, 128>}, {pipeline_mode = #tpu.pipeline_mode<synchronous>, transform_indices = @transform_3, window_bounds = array<i64: 600, 32>}, {pipeline_mode = #tpu.pipeline_mode<synchronous>, transform_indices = @transform_4, window_bounds = array<i64: 40, 32>}, {transform_indices = @transform_5, window_bounds = array<i64: 1, 1, 128>}]} {
    %c0 = arith.constant 0 : index
    %c0_0 = arith.constant 0 : index
    %c0_1 = arith.constant 0 : index
    %0 = vector.load %arg1[%c0, %c0_0, %c0_1] : memref<1x1x128xi32, #tpu.memory_space<vmem>>, vector<1x1x128xi32>
    %1 = vector.shape_cast %0 : vector<1x1x128xi32> to vector<1x128xi32>
    %c0_2 = arith.constant 0 : index
    %c0_3 = arith.constant 0 : index
    %c0_4 = arith.constant 0 : index
    %2 = vector.load %arg3[%c0_2, %c0_3, %c0_4] : memref<1x1x128xi32, #tpu.memory_space<vmem>>, vector<1x1x128xi32>
    %3 = vector.shape_cast %2 : vector<1x1x128xi32> to vector<1x128xi32>
    %4 = tpu.iota {dimensions = array<i32: 0>} : vector<256x128xi32>
    %cst = arith.constant 0.000000e+00 : f32
    %5 = vector.broadcast %cst : f32 to vector<32x128xf32>
    %c0_i32 = arith.constant 0 : i32
    %c2_i32 = arith.constant 2 : i32
    %6 = arith.addi %c0_i32, %c2_i32 : i32
    %c1_i32 = arith.constant 1 : i32
    %7 = scf.for %arg7 = %c0_i32 to %6 step %c1_i32 iter_args(%arg8 = %5) -> (vector<32x128xf32>)  : i32 {
      %c256_i32 = arith.constant 256 : i32
      %40 = arith.muli %arg7, %c256_i32 : i32
      %41 = tpu.assume_multiple %40, 256 : i32
      %42 = arith.index_cast %41 : i32 to index
      %c0_18 = arith.constant 0 : index
      %43 = vector.load %arg4[%42, %c0_18] : memref<600x32xf32, #tpu.memory_space<vmem>>, vector<256x32xf32>
      %44 = vector.broadcast %41 : i32 to vector<256x128xi32>
      %45 = arith.addi %4, %44 : vector<256x128xi32>
      %46 = vector.broadcast %1 : vector<1x128xi32> to vector<256x128xi32>
      %47 = arith.cmpi eq, %45, %46 : vector<256x128xi32>
      %48 = arith.extui %47 : vector<256x128xi1> to vector<256x128xi32>
      %49 = arith.sitofp %48 : vector<256x128xi32> to vector<256x128xf32>
      %50 = vector.broadcast %3 : vector<1x128xi32> to vector<256x128xi32>
      %51 = arith.cmpi eq, %45, %50 : vector<256x128xi32>
      %52 = arith.extui %51 : vector<256x128xi1> to vector<256x128xi32>
      %53 = arith.sitofp %52 : vector<256x128xi32> to vector<256x128xf32>
      %54 = arith.subf %49, %53 : vector<256x128xf32>
      %cst_19 = arith.constant dense<0.000000e+00> : vector<32x128xf32>
      %55 = tpu.matmul %43, %54, %cst_19 {dimension_numbers = #tpu.dot_dimension_numbers<[0], [0], [1], [1], [0, 1, 1, 1], [], []>} : vector<256x32xf32>, vector<256x128xf32>, vector<32x128xf32> -> vector<32x128xf32>
      %56 = arith.addf %arg8, %55 : vector<32x128xf32>
      scf.yield %56 : vector<32x128xf32>
    }
    %c2_i32_5 = arith.constant 2 : i32
    %c512 = arith.constant 512 : index
    %c0_6 = arith.constant 0 : index
    %8 = vector.load %arg4[%c512, %c0_6] : memref<600x32xf32, #tpu.memory_space<vmem>>, vector<88x32xf32>
    %9 = vector.extract_strided_slice %4 {offsets = [0, 0], sizes = [88, 128], strides = [1, 1]} : vector<256x128xi32> to vector<88x128xi32>
    %c512_i32 = arith.constant 512 : i32
    %10 = vector.broadcast %c512_i32 : i32 to vector<88x128xi32>
    %11 = arith.addi %9, %10 : vector<88x128xi32>
    %12 = vector.broadcast %1 : vector<1x128xi32> to vector<88x128xi32>
    %13 = arith.cmpi eq, %11, %12 : vector<88x128xi32>
    %14 = arith.extui %13 : vector<88x128xi1> to vector<88x128xi32>
    %15 = arith.sitofp %14 : vector<88x128xi32> to vector<88x128xf32>
    %16 = vector.broadcast %3 : vector<1x128xi32> to vector<88x128xi32>
    %17 = arith.cmpi eq, %11, %16 : vector<88x128xi32>
    %18 = arith.extui %17 : vector<88x128xi1> to vector<88x128xi32>
    %19 = arith.sitofp %18 : vector<88x128xi32> to vector<88x128xf32>
    %20 = arith.subf %15, %19 : vector<88x128xf32>
    %cst_7 = arith.constant dense<0.000000e+00> : vector<32x128xf32>
    %21 = tpu.matmul %8, %20, %cst_7 {dimension_numbers = #tpu.dot_dimension_numbers<[0], [0], [1], [1], [0, 1, 1, 1], [], []>} : vector<88x32xf32>, vector<88x128xf32>, vector<32x128xf32> -> vector<32x128xf32>
    %22 = arith.addf %7, %21 : vector<32x128xf32>
    %c0_8 = arith.constant 0 : index
    %c0_9 = arith.constant 0 : index
    %c0_10 = arith.constant 0 : index
    %23 = vector.load %arg2[%c0_8, %c0_9, %c0_10] : memref<1x1x128xi32, #tpu.memory_space<vmem>>, vector<1x1x128xi32>
    %24 = vector.shape_cast %23 : vector<1x1x128xi32> to vector<1x128xi32>
    %25 = vector.extract_strided_slice %4 {offsets = [0, 0], sizes = [40, 128], strides = [1, 1]} : vector<256x128xi32> to vector<40x128xi32>
    %26 = vector.broadcast %24 : vector<1x128xi32> to vector<40x128xi32>
    %27 = arith.cmpi eq, %25, %26 : vector<40x128xi32>
    %28 = arith.extui %27 : vector<40x128xi1> to vector<40x128xi32>
    %29 = arith.sitofp %28 : vector<40x128xi32> to vector<40x128xf32>
    %c0_11 = arith.constant 0 : index
    %c0_12 = arith.constant 0 : index
    %30 = vector.load %arg5[%c0_11, %c0_12] : memref<40x32xf32, #tpu.memory_space<vmem>>, vector<40x32xf32>
    %cst_13 = arith.constant dense<0.000000e+00> : vector<32x128xf32>
    %31 = tpu.matmul %30, %29, %cst_13 {dimension_numbers = #tpu.dot_dimension_numbers<[0], [0], [1], [1], [0, 1, 1, 1], [], []>} : vector<40x32xf32>, vector<40x128xf32>, vector<32x128xf32> -> vector<32x128xf32>
    %32 = arith.addf %22, %31 : vector<32x128xf32>
    %33 = arith.mulf %32, %32 : vector<32x128xf32>
    %cst_14 = arith.constant dense<0.000000e+00> : vector<128xf32>
    %34 = vector.multi_reduction <add>, %33, %cst_14 [0] : vector<32x128xf32> to vector<128xf32>
    %35 = vector.shape_cast %34 : vector<128xf32> to vector<1x128xf32>
    %36 = math.sqrt %35 : vector<1x128xf32>
    %c0_15 = arith.constant 0 : index
    %c0_16 = arith.constant 0 : index
    %c0_17 = arith.constant 0 : index
    %37 = vector.load %arg6[%c0_15, %c0_16, %c0_17] : memref<1x1x128xf32, #tpu.memory_space<vmem>>, vector<1x1x128xf32>
    %38 = vector.shape_cast %37 : vector<1x1x128xf32> to vector<1x128xf32>
    %39 = vector.shape_cast %36 : vector<1x128xf32> to vector<1x1x128xf32>
    tpu.vector_store %arg6[%c0_15, %c0_16, %c0_17], %39 {strides = array<i32>} : memref<1x1x128xf32, #tpu.memory_space<vmem>>, vector<1x1x128xf32>,
    return
  }
  func.func @transform_0(%arg0: i32) -> (i32, i32, i32) {
    %c0_i32 = arith.constant 0 : i32
    %c0_i32_0 = arith.constant 0 : i32
    %c0_i32_1 = arith.constant 0 : i32
    return %arg0, %c0_i32, %c0_i32_0 : i32, i32, i32
  }
  func.func @transform_1(%arg0: i32) -> (i32, i32, i32) {
    %c0_i32 = arith.constant 0 : i32
    %c0_i32_0 = arith.constant 0 : i32
    %c0_i32_1 = arith.constant 0 : i32
    return %arg0, %c0_i32, %c0_i32_0 : i32, i32, i32
  }
  func.func @transform_2(%arg0: i32) -> (i32, i32, i32) {
    %c0_i32 = arith.constant 0 : i32
    %c0_i32_0 = arith.constant 0 : i32
    %c0_i32_1 = arith.constant 0 : i32
    return %arg0, %c0_i32, %c0_i32_0 : i32, i32, i32
  }
  func.func @transform_3(%arg0: i32) -> (i32, i32) {
    %c0_i32 = arith.constant 0 : i32
    %c0_i32_0 = arith.constant 0 : i32
    %c0_i32_1 = arith.constant 0 : i32
    return %c0_i32, %c0_i32_0 : i32, i32
  }
  func.func @transform_4(%arg0: i32) -> (i32, i32) {
    %c0_i32 = arith.constant 0 : i32
    %c0_i32_0 = arith.constant 0 : i32
    %c0_i32_1 = arith.constant 0 : i32
    return %c0_i32, %c0_i32_0 : i32, i32
  }
  func.func @transform_5(%arg0: i32) -> (i32, i32, i32) {
    %c0_i32 = arith.constant 0 : i32
    %c0_i32_0 = arith.constant 0 : i32
    %c0_i32_1 = arith.constant 0 : i32
    return %arg0, %c0_i32, %c0_i32_0 : i32, i32, i32
  }
}

module attributes {stable_mosaic.version = 11 : i64} {
  func.func @_score_kernel(%arg0: i32, %arg1: memref<1x1x128xi32, #tpu.memory_space<vmem>>, %arg2: memref<1x1x128xi32, #tpu.memory_space<vmem>>, %arg3: memref<1x1x128xi32, #tpu.memory_space<vmem>>, %arg4: memref<600x32xf32, #tpu.memory_space<vmem>>, %arg5: memref<40x32xf32, #tpu.memory_space<vmem>>, %arg6: memref<1x1x128xf32, #tpu.memory_space<vmem>>) attributes {dimension_semantics = [#tpu.dimension_semantics<parallel>], iteration_bounds = array<i64: 3>, scalar_prefetch = 0 : i64, scratch_operands = 0 : i64, tpu.core_type = #tpu.core_type<tc>, window_params = [{transform_indices = @transform_0, window_bounds = array<i64: 1, 1, 128>}, {transform_indices = @transform_1, window_bounds = array<i64: 1, 1, 128>}, {transform_indices = @transform_2, window_bounds = array<i64: 1, 1, 128>}, {pipeline_mode = #tpu.pipeline_mode<synchronous>, transform_indices = @transform_3, window_bounds = array<i64: 600, 32>}, {pipeline_mode = #tpu.pipeline_mode<synchronous>, transform_indices = @transform_4, window_bounds = array<i64: 40, 32>}, {transform_indices = @transform_5, window_bounds = array<i64: 1, 1, 128>}]} {
    %c0 = arith.constant 0 : index
    %c0_0 = arith.constant 0 : index
    %c0_1 = arith.constant 0 : index
    %0 = vector.load %arg1[%c0, %c0_0, %c0_1] : memref<1x1x128xi32, #tpu.memory_space<vmem>>, vector<1x1x128xi32>
    %1 = vector.shape_cast %0 : vector<1x1x128xi32> to vector<1x128xi32>
    %c0_2 = arith.constant 0 : index
    %c0_3 = arith.constant 0 : index
    %c0_4 = arith.constant 0 : index
    %2 = vector.load %arg3[%c0_2, %c0_3, %c0_4] : memref<1x1x128xi32, #tpu.memory_space<vmem>>, vector<1x1x128xi32>
    %3 = vector.shape_cast %2 : vector<1x1x128xi32> to vector<1x128xi32>
    %4 = tpu.iota {dimensions = array<i32: 0>} : vector<256x128xi32>
    %cst = arith.constant 0.000000e+00 : f32
    %5 = vector.broadcast %cst : f32 to vector<32x128xf32>
    %c0_i32 = arith.constant 0 : i32
    %c2_i32 = arith.constant 2 : i32
    %6 = arith.addi %c0_i32, %c2_i32 : i32
    %c1_i32 = arith.constant 1 : i32
    %7 = scf.for %arg7 = %c0_i32 to %6 step %c1_i32 iter_args(%arg8 = %5) -> (vector<32x128xf32>)  : i32 {
      %c256_i32 = arith.constant 256 : i32
      %40 = arith.muli %arg7, %c256_i32 : i32
      %41 = tpu.assume_multiple %40, 256 : i32
      %42 = arith.index_cast %41 : i32 to index
      %c0_18 = arith.constant 0 : index
      %43 = vector.load %arg4[%42, %c0_18] : memref<600x32xf32, #tpu.memory_space<vmem>>, vector<256x32xf32>
      %44 = vector.broadcast %41 : i32 to vector<256x128xi32>
      %45 = arith.addi %4, %44 : vector<256x128xi32>
      %46 = vector.broadcast %1 : vector<1x128xi32> to vector<256x128xi32>
      %47 = arith.cmpi eq, %45, %46 : vector<256x128xi32>
      %48 = arith.extui %47 : vector<256x128xi1> to vector<256x128xi32>
      %49 = arith.sitofp %48 : vector<256x128xi32> to vector<256x128xf32>
      %50 = vector.broadcast %3 : vector<1x128xi32> to vector<256x128xi32>
      %51 = arith.cmpi eq, %45, %50 : vector<256x128xi32>
      %52 = arith.extui %51 : vector<256x128xi1> to vector<256x128xi32>
      %53 = arith.sitofp %52 : vector<256x128xi32> to vector<256x128xf32>
      %54 = arith.subf %49, %53 : vector<256x128xf32>
      %cst_19 = arith.constant dense<0.000000e+00> : vector<32x128xf32>
      %55 = tpu.matmul %43, %54, %cst_19 {dimension_numbers = #tpu.dot_dimension_numbers<[0], [0], [1], [1], [0, 1, 1, 1], [], []>} : vector<256x32xf32>, vector<256x128xf32>, vector<32x128xf32> -> vector<32x128xf32>
      %56 = arith.addf %arg8, %55 : vector<32x128xf32>
      scf.yield %56 : vector<32x128xf32>
    }
    %c2_i32_5 = arith.constant 2 : i32
    %c512 = arith.constant 512 : index
    %c0_6 = arith.constant 0 : index
    %8 = vector.load %arg4[%c512, %c0_6] : memref<600x32xf32, #tpu.memory_space<vmem>>, vector<88x32xf32>
    %9 = vector.extract_strided_slice %4 {offsets = [0, 0], sizes = [88, 128], strides = [1, 1]} : vector<256x128xi32> to vector<88x128xi32>
    %c512_i32 = arith.constant 512 : i32
    %10 = vector.broadcast %c512_i32 : i32 to vector<88x128xi32>
    %11 = arith.addi %9, %10 : vector<88x128xi32>
    %12 = vector.broadcast %1 : vector<1x128xi32> to vector<88x128xi32>
    %13 = arith.cmpi eq, %11, %12 : vector<88x128xi32>
    %14 = arith.extui %13 : vector<88x128xi1> to vector<88x128xi32>
    %15 = arith.sitofp %14 : vector<88x128xi32> to vector<88x128xf32>
    %16 = vector.broadcast %3 : vector<1x128xi32> to vector<88x128xi32>
    %17 = arith.cmpi eq, %11, %16 : vector<88x128xi32>
    %18 = arith.extui %17 : vector<88x128xi1> to vector<88x128xi32>
    %19 = arith.sitofp %18 : vector<88x128xi32> to vector<88x128xf32>
    %20 = arith.subf %15, %19 : vector<88x128xf32>
    %cst_7 = arith.constant dense<0.000000e+00> : vector<32x128xf32>
    %21 = tpu.matmul %8, %20, %cst_7 {dimension_numbers = #tpu.dot_dimension_numbers<[0], [0], [1], [1], [0, 1, 1, 1], [], []>} : vector<88x32xf32>, vector<88x128xf32>, vector<32x128xf32> -> vector<32x128xf32>
    %22 = arith.addf %7, %21 : vector<32x128xf32>
    %c0_8 = arith.constant 0 : index
    %c0_9 = arith.constant 0 : index
    %c0_10 = arith.constant 0 : index
    %23 = vector.load %arg2[%c0_8, %c0_9, %c0_10] : memref<1x1x128xi32, #tpu.memory_space<vmem>>, vector<1x1x128xi32>
    %24 = vector.shape_cast %23 : vector<1x1x128xi32> to vector<1x128xi32>
    %25 = vector.extract_strided_slice %4 {offsets = [0, 0], sizes = [40, 128], strides = [1, 1]} : vector<256x128xi32> to vector<40x128xi32>
    %26 = vector.broadcast %24 : vector<1x128xi32> to vector<40x128xi32>
    %27 = arith.cmpi eq, %25, %26 : vector<40x128xi32>
    %28 = arith.extui %27 : vector<40x128xi1> to vector<40x128xi32>
    %29 = arith.sitofp %28 : vector<40x128xi32> to vector<40x128xf32>
    %c0_11 = arith.constant 0 : index
    %c0_12 = arith.constant 0 : index
    %30 = vector.load %arg5[%c0_11, %c0_12] : memref<40x32xf32, #tpu.memory_space<vmem>>, vector<40x32xf32>
    %cst_13 = arith.constant dense<0.000000e+00> : vector<32x128xf32>
    %31 = tpu.matmul %30, %29, %cst_13 {dimension_numbers = #tpu.dot_dimension_numbers<[0], [0], [1], [1], [0, 1, 1, 1], [], []>} : vector<40x32xf32>, vector<40x128xf32>, vector<32x128xf32> -> vector<32x128xf32>
    %32 = arith.addf %22, %31 : vector<32x128xf32>
    %33 = arith.mulf %32, %32 : vector<32x128xf32>
    %cst_14 = arith.constant dense<0.000000e+00> : vector<128xf32>
    %34 = vector.multi_reduction <add>, %33, %cst_14 [0] : vector<32x128xf32> to vector<128xf32>
    %35 = vector.shape_cast %34 : vector<128xf32> to vector<1x128xf32>
    %36 = math.sqrt %35 : vector<1x128xf32>
    %c0_15 = arith.constant 0 : index
    %c0_16 = arith.constant 0 : index
    %c0_17 = arith.constant 0 : index
    %37 = vector.load %arg6[%c0_15, %c0_16, %c0_17] : memref<1x1x128xf32, #tpu.memory_space<vmem>>, vector<1x1x128xf32>
    %38 = vector.shape_cast %37 : vector<1x1x128xf32> to vector<1x128xf32>
    %39 = vector.shape_cast %36 : vector<1x128xf32> to vector<1x1x128xf32>
    tpu.vector_store %arg6[%c0_15, %c0_16, %c0_17], %39 {strides = array<i32>} : memref<1x1x128xf32, #tpu.memory_space<vmem>>, vector<1x1x128xf32>,
    return
  }
  func.func @transform_0(%arg0: i32) -> (i32, i32, i32) {
    %c0_i32 = arith.constant 0 : i32
    %c0_i32_0 = arith.constant 0 : i32
    %c0_i32_1 = arith.constant 0 : i32
    return %arg0, %c0_i32, %c0_i32_0 : i32, i32, i32
  }
  func.func @transform_1(%arg0: i32) -> (i32, i32, i32) {
    %c0_i32 = arith.constant 0 : i32
    %c0_i32_0 = arith.constant 0 : i32
    %c0_i32_1 = arith.constant 0 : i32
    return %arg0, %c0_i32, %c0_i32_0 : i32, i32, i32
  }
  func.func @transform_2(%arg0: i32) -> (i32, i32, i32) {
    %c0_i32 = arith.constant 0 : i32
    %c0_i32_0 = arith.constant 0 : i32
    %c0_i32_1 = arith.constant 0 : i32
    return %arg0, %c0_i32, %c0_i32_0 : i32, i32, i32
  }
  func.func @transform_3(%arg0: i32) -> (i32, i32) {
    %c0_i32 = arith.constant 0 : i32
    %c0_i32_0 = arith.constant 0 : i32
    %c0_i32_1 = arith.constant 0 : i32
    return %c0_i32, %c0_i32_0 : i32, i32
  }
  func.func @transform_4(%arg0: i32) -> (i32, i32) {
    %c0_i32 = arith.constant 0 : i32
    %c0_i32_0 = arith.constant 0 : i32
    %c0_i32_1 = arith.constant 0 : i32
    return %c0_i32, %c0_i32_0 : i32, i32
  }
  func.func @transform_5(%arg0: i32) -> (i32, i32, i32) {
    %c0_i32 = arith.constant 0 : i32
    %c0_i32_0 = arith.constant 0 : i32
    %c0_i32_1 = arith.constant 0 : i32
    return %arg0, %c0_i32, %c0_i32_0 : i32, i32, i32
  }
}

</mosaic_0001>

<bundles_post_ra>
// kernel: tpu_custom_call.1
= control target key start
LH: loop header
LB: loop body
LE: loop exit
PB: predicated region body
PF: predicated region fallthrough
CT: control target
= control target key end

     0   :  { %10 = vsyncpa [#allocation3], 0  ;;  %s2621_s0 = inlined_call_operand.vmem [shape: s32[3,1,128], index: 0, kind: input, shape index: {}]   ;;  %s2622_s1 = inlined_call_operand.vmem [shape: s32[3,1,128], index: 1, kind: input, shape index: {}]   ;;  %s2623_s2 = inlined_call_operand.vmem [shape: s32[3,1,128], index: 2, kind: input, shape index: {}]   ;;  %s2624_s3 = inlined_call_operand.vmem [shape: f32[600,32], index: 3, kind: input, shape index: {}]   ;;  %s2625_s4 = inlined_call_operand.vmem [shape: f32[40,32], index: 4, kind: input, shape index: {}]   ;;  %s2626_s5 = inlined_call_operand.hbm [shape: f32[3,1,128], index: 5, kind: output, shape index: {}]  }
   0x1   :  { %12 = vsyncpa [#allocation3 + $0x1], 0  ;;  %s1851_s18 = smov 0   ;;  %s1853_s19 = smov 0  }
   0x2   :  { %s1855_s20 = smov 0   ;;  %s1857_s21 = smov 0  }
   0x3 LB: > { %s1872_s22 = sadd.s32 4294967295, %s1794_s21   ;;  %s1264_s23 = sadd.s32 4294967294, %s1794_s21   ;;  %s1794_s21 = sphi %s1857_s21, %s2691_s21   ;;  %s1790_s20 = sphi %s1855_s20, %s2690_s20   ;;  %s1786_s19 = sphi %s1853_s19, %s2689_s19   ;;  %s1782_s18 = sphi %s1851_s18, %s2688_s18  }
   0x4   : > { %s1876_s24 = sadd.s32 1, %s1794_s21   ;;  %s145_s25 = sadd.s32 1, %s1790_s20 }
   0x5   : > { %s142_s26 = ssub.s32 %s1794_s21, %s1876_s24  ;;  %p155_p0 = scmp.ne.s32.totalorder %s1790_s20, %s1786_s19 }
   0x6   : > { %p143_p1 = scmp.eq.s32.totalorder %s142_s26, 0  ;;  %p156_p2 = scmp.eq.s32.totalorder %s1872_s22, 2 }
   0x7   : > { %p161_p3 = scmp.ne.s32.totalorder %s1786_s19, %s1782_s18  ;;  %p162_p4 = scmp.eq.s32.totalorder %s1264_s23, 2 }
   0x8   : > { %s1887_s27 = scalar_select %p143_p1, %s1790_s20, %s145_s25  }
   0x9   : > { %p1889_p5 = por %p156_p2, %p155_p0  ;;  %p1893_p6 = por %p162_p4, %p161_p3 }
   0xa   : > { %p1267_p7 = scmp.ge.s32.totalorder %s1794_s21, 1  ;;  %p204_p8 = scmp.lt.s32.totalorder %s1794_s21, 4 }
   0xc   : > { %p205_p9 = pnand %p1267_p7, %p204_p8 }
   0xe   : > { %208 = sbr.rel (%p205_p9) target bundleno = 789 (0x315), region = 40 }
  0x15   : > { %s233_s30 = sand.u32 1, %s1786_s19   ;;  %p235_p10 = scmp.lt.s32.totalorder %s1872_s22, 2  ;;  %v246_v0 = vlaneseq  ;;  %v2019_v35 = vmov 0.0   ;;  %v2021_v36 = vmov 0.0   ;;  %v2023_v37 = vmov 0.0  }
  0x16   : > { %s2017_s16 = scalar_lea.vmem [#allocation2], %s233_s30  ;;  %v2025_v38 = vmov 0.0   ;;  %s2027_s17 = smov 0  }
  0x17   : > { %s1902_s6 = scalar_select %p235_p10, %s1872_s22, 2  ;;  %v1904_v1 = vshrl.u32 %v246_v0, 7 }
  0x19   : > { %2635 = vst [vmem:[#allocation5_spill] sm:$0xff] %v1904_v1  ;;  %s237_s9 = scalar_lea.vmem %s2621_s0, %s1902_s6  ;;  %s240_s12 = scalar_lea.vmem %s2622_s1, %s1902_s6  ;;  %v1915_v2 = vadd.s32 8, %v1904_v1  ;;  %v1918_v3 = vadd.s32 16, %v1904_v1  ;;  %v1921_v4 = vadd.s32 24, %v1904_v1  ;;  %v1924_v5 = vadd.s32 32, %v1904_v1 }
  0x1a   : > { %s243_s15 = scalar_lea.vmem %s2623_s2, %s1902_s6  ;;  %v1930_v6 = vld [vmem:[%s237_s9] ss:$0 sm:$0xff]  ;;  %v1933_v7 = vadd.s32 40, %v1904_v1  ;;  %v1936_v8 = vadd.s32 48, %v1904_v1  ;;  %v1939_v9 = vadd.s32 56, %v1904_v1  ;;  %v1942_v10 = vadd.s32 64, %v1904_v1 }
  0x1b   : > { %2636 = vst [vmem:[#allocation6_spill] sm:$0xff] %v1915_v2  ;;  %2637 = vst [vmem:[#allocation7_spill] sm:$0xff] %v1918_v3  ;;  %v1944_v11 = vld [vmem:[%s243_s15] ss:$0 sm:$0xff]  ;;  %v1947_v12 = vadd.s32 72, %v1904_v1  ;;  %v1950_v13 = vadd.s32 80, %v1904_v1 }
  0x1c   : > { %v1953_v14 = vadd.s32 88, %v1904_v1  ;;  %v1956_v15 = vadd.s32 96, %v1904_v1  ;;  %v1959_v16 = vadd.s32 104, %v1904_v1  ;;  %v1962_v17 = vadd.s32 112, %v1904_v1 }
  0x1d   : > { %v1965_v18 = vadd.s32 120, %v1904_v1  ;;  %v1968_v19 = vadd.s32 128, %v1904_v1  ;;  %v1971_v20 = vadd.s32 136, %v1904_v1  ;;  %v1974_v21 = vadd.s32 144, %v1904_v1 }
  0x1e   : > { %2638 = vst [vmem:[#allocation8_spill] sm:$0xff] %v1962_v17  ;;  %v1977_v22 = vadd.s32 152, %v1904_v1  ;;  %v1980_v23 = vadd.s32 160, %v1904_v1  ;;  %v1983_v24 = vadd.s32 168, %v1904_v1  ;;  %v1986_v25 = vadd.s32 176, %v1904_v1 }
  0x1f   : > { %2639 = vst [vmem:[#allocation9_spill] sm:$0xff] %v1965_v18  ;;  %2640 = vst [vmem:[#allocation10_spill] sm:$0xff] %v1968_v19  ;;  %v1989_v26 = vadd.s32 184, %v1904_v1  ;;  %v1992_v27 = vadd.s32 192, %v1904_v1  ;;  %v1995_v28 = vadd.s32 200, %v1904_v1  ;;  %v1998_v29 = vadd.s32 208, %v1904_v1 }
  0x20   : > { %2641 = vst [vmem:[#allocation11_spill] sm:$0xff] %v1971_v20  ;;  %2642 = vst [vmem:[#allocation12_spill] sm:$0xff] %v1974_v21  ;;  %v2001_v30 = vadd.s32 216, %v1904_v1  ;;  %v2004_v31 = vadd.s32 224, %v1904_v1  ;;  %v2007_v32 = vadd.s32 232, %v1904_v1  ;;  %v2010_v33 = vadd.s32 240, %v1904_v1 }
  0x21   : > { %2643 = vst [vmem:[#allocation13_spill] sm:$0xff] %v1977_v22  ;;  %v2013_v34 = vadd.s32 248, %v1904_v1 }
  0x23   : > { %2644 = vst [vmem:[#allocation14_spill] sm:$0xff] %v2013_v34 }
  0x24 LB: >> { %2645 = vst [vmem:[#allocation15_spill] sm:$0xff] %v1798_v35  ;;  %2646 = vst [vmem:[#allocation16_spill] sm:$0xff] %v1802_v36  ;;  %s1268_s23 = sshll.u32 %s1814_s17, 8  ;;  %v2651_v1 = vld [vmem:[#allocation5_spill] sm:$0xff]  ;;  %v2652_v2 = vld [vmem:[#allocation6_spill] sm:$0xff]  ;;  %v2631_v61 = vmov 0.0   ;;  %s1814_s17 = sphi %s2027_s17, %s284_s17   ;;  %v1810_v38 = vphi %v2025_v38, %v2680_v38   ;;  %v1806_v37 = vphi %v2023_v37, %v2679_v37   ;;  %v1802_v36 = vphi %v2021_v36, %v2678_v36   ;;  %v1798_v35 = vphi %v2019_v35, %v2677_v35  }
  0x25   : >> { %2647 = vst [vmem:[#allocation17_spill] sm:$0xff] %v1806_v37  ;;  %2648 = vst [vmem:[#allocation18_spill] sm:$0xff] %v1810_v38  ;;  %s2048_s7 = scalar_lea.vmem %s2624_s3, %s1268_s23  ;;  %v2050_v39 = vstv %s1268_s23  ;;  %v2655_v3 = vld [vmem:[#allocation7_spill] sm:$0xff]  ;;  %s284_s17 = sadd.s32 1, %s1814_s17  }
  0x26   : >> { %v291_v40 = vld [vmem:[%s2048_s7] sm:$0xff]  ;;  %v292_v42 = vld [vmem:[%s2048_s7 + $0x8] sm:$0xff]  ;;  %v2061_v47 = vld [vmem:[%s2048_s7 + $0x10] sm:$0xff]  ;;  %v324_v49 = vadd.s32 %v2050_v39, %v2651_v1  ;;  %v325_v50 = vadd.s32 %v2050_v39, %v2652_v2  ;;  %v2091_v56 = vadd.s32 %v2050_v39, %v2655_v3  ;;  %p281_p11 = scmp.ge.s32.totalorder %s284_s17, 2  }
  0x27   : >> { %v307_v41 = vld [vmem:[%s2048_s7 + $0x80] sm:$0xff]  ;;  %v2649_v19 = vld [vmem:[#allocation10_spill] sm:$0xff]  ;;  %v2650_v20 = vld [vmem:[#allocation11_spill] sm:$0xff]  ;;  %s1374_s15 = sshll.u32 (%p281_p11), %s1872_s22, 4  ;;  %s1175_s17 = sshll.u32 (%p281_p11), %s2017_s16, 4  ;;  %s2578_s17 = int_to_ptr.vmem [resolvable:$true] %s1175_s17 }
  0x28   : >> { %v340_v43 = vadd.s32 %v2050_v39, %v2649_v19  ;;  %v341_v44 = vadd.s32 %v2050_v39, %v2650_v20  ;;  %v1658_v45 = vpack.i.bf16 %v291_v40, %v307_v41  ;;  %v308_v46 = vld [vmem:[%s2048_s7 + $0x88] sm:$0xff]  ;;  %v2064_v48 = vld [vmem:[%s2048_s7 + $0x90] sm:$0xff]  ;;  %v2653_v21 = vld [vmem:[#allocation12_spill] sm:$0xff]  ;;  %vm360_vm4 = vcmp.eq.s32.totalorder %v324_v49, %v1930_v6  ;;  %s2576_s26 = scalar_lea.hbm (%p281_p11), %s2626_s5, %s1374_s15  ;;  %s1163_s22 = scalar_lea.sflag (%p281_p11), [#allocation3], %s233_s30 }
  0x29   : >> { %v2072_v51 = vadd.s32 %v2050_v39, %v2653_v21  ;;  %v2075_v52 = vld [vmem:[%s2048_s7 + $0x18] sm:$0xff]  ;;  %v2081_v54 = vld [vmem:[%s2048_s7 + $0x20] sm:$0xff]  ;;  %v1660_v57 = vpack.i.bf16 %v292_v42, %v308_v46  ;;  %v2097_v59 = vld [vmem:[%s2048_s7 + $0x28] sm:$0xff]  ;;  %v1662_v0 = vpack.i.bf16 %v2061_v47, %v2064_v48  ;;  %vm361_vm5 = vcmp.eq.s32.totalorder %v325_v50, %v1930_v6  ;;  %s1820_s8 = smov (%p281_p11), [#allocation2]  }
  0x2a   : >> { %v2078_v53 = vld [vmem:[%s2048_s7 + $0x98] sm:$0xff]  ;;  %vm376_vm0 = vcmp.eq.s32.totalorder %v340_v43, %v1930_v6  ;;  %vm377_vm1 = vcmp.eq.s32.totalorder %v341_v44, %v1930_v6  ;;  %v2654_v22 = vld [vmem:[#allocation13_spill] sm:$0xff]  ;;  %1659 = vxpose.xlu0.b32.start [1/16] (narrow) %v1658_v45, 32  ;;  %vm476_vm2 = vcmp.eq.s32.totalorder %v340_v43, %v1944_v11  ;;  %v2110_v41 = vld [vmem:[%s2048_s7 + $0x30] sm:$0xff]  ;;  %vm477_vm3 = vcmp.eq.s32.totalorder %v341_v44, %v1944_v11  ;;  %s1716_s9 = sshll.u32 (%p281_p11), %s1820_s8, 4  ;;  %s1717_s9 = int_to_ptr.vmem [resolvable:$false] %s1716_s9 }
  0x2b   : >> { %v2087_v55 = vadd.s32 %v2050_v39, %v2654_v22  ;;  %v2094_v58 = vld [vmem:[%s2048_s7 + $0xa0] sm:$0xff]  ;;  %v2100_v60 = vld [vmem:[%s2048_s7 + $0xa8] sm:$0xff]  ;;  %v1285_v62 = vsel %vm376_vm0, 1.0, %v2631_v61  ;;  %v1286_v63 = vsel %vm377_vm1, 1.0, %v2631_v61  ;;  %v2113_v42 = vld [vmem:[%s2048_s7 + $0xb0] sm:$0xff]  ;;  %v1317_v46 = vsel %vm476_vm2, 1.0, %v2631_v61  ;;  %p1719_p1 = scmp.lt.s32.totalorder (%p281_p11), %s2578_s17, %s1717_s9 }
  0x2c   : >> { %v2116_v45 = vld [vmem:[%s2048_s7 + $0x38] sm:$0xff]  ;;  %v2126_v48 = vld [vmem:[%s2048_s7 + $0x40] sm:$0xff]  ;;  %v1318_v19 = vsel %vm477_vm3, 1.0, %v2631_v61  ;;  %v572_v20 = vsub.f32 %v1285_v62, %v1317_v46  ;;  %v2138_v21 = vld [vmem:[%s2048_s7 + $0x48] sm:$0xff]  ;;  %v1269_v1 = vsel %vm360_vm4, 1.0, %v2631_v61  ;;  %v1270_v35 = vsel %vm361_vm5, 1.0, %v2631_v61 }
  0x2d   : >> { %v2123_v47 = vld [vmem:[%s2048_s7 + $0xb8] sm:$0xff]  ;;  %v2129_v40 = vld [vmem:[%s2048_s7 + $0xc0] sm:$0xff]  ;;  %v2141_v22 = vld [vmem:[%s2048_s7 + $0xc8] sm:$0xff]  ;;  %v573_v2 = vsub.f32 %v1286_v63, %v1318_v19  ;;  %vm460_vm6 = vcmp.eq.s32.totalorder %v324_v49, %v1944_v11  ;;  %vm461_vm7 = vcmp.eq.s32.totalorder %v325_v50, %v1944_v11  ;;  %v2656_v49 = vmov 0.0   ;;  %s1718_s10 = scalar_lea.vmem (%p281_p11), %s1717_s9, 32 }
  0x2e   : >> { %v2144_v3 = vld [vmem:[%s2048_s7 + $0x50] sm:$0xff]  ;;  %1661 = vxpose.xlu0.b32.cont [2/16] (narrow) %v1660_v57, 32  ;;  %v2153_v43 = vld [vmem:[%s2048_s7 + $0x58] sm:$0xff]  ;;  %v2166_v63 = vld [vmem:[%s2048_s7 + $0x60] sm:$0xff]  ;;  %v1301_v18 = vsel %vm460_vm6, 1.0, %v2656_v49  ;;  %v1302_v19 = vsel %vm461_vm7, 1.0, %v2656_v49  ;;  %vm378_vm8 = vcmp.eq.s32.totalorder %v2072_v51, %v1930_v6  ;;  %vm379_vm9 = vcmp.eq.s32.totalorder %v2087_v55, %v1930_v6 }
  0x2f   : >> { %v2150_v46 = vld [vmem:[%s2048_s7 + $0xd0] sm:$0xff]  ;;  %v2156_v44 = vld [vmem:[%s2048_s7 + $0xd8] sm:$0xff]  ;;  %v2169_v62 = vld [vmem:[%s2048_s7 + $0xe0] sm:$0xff]  ;;  %v1491_v37 = vpack.c.bf16 %v573_v2, %v572_v20  ;;  %v556_v20 = vsub.f32 %v1269_v1, %v1301_v18  ;;  %v557_v50 = vsub.f32 %v1270_v35, %v1302_v19  ;;  %v1287_v17 = vsel %vm378_vm8, 1.0, %v2656_v49 }
  0x30   : >> { %v2172_v36 = vld [vmem:[%s2048_s7 + $0x68] sm:$0xff]  ;;  %v1682_v2 = vpack.i.bf16 %v2166_v63, %v2169_v62  ;;  %vm478_vm10 = vcmp.eq.s32.totalorder %v2072_v51, %v1944_v11  ;;  %v1288_v34 = vsel %vm379_vm9, 1.0, %v2656_v49  ;;  %vm479_vm11 = vcmp.eq.s32.totalorder %v2087_v55, %v1944_v11 }
  0x31   : >> { %v2178_v38 = vld [vmem:[%s2048_s7 + $0xe8] sm:$0xff]  ;;  %1492 = vmatprep.subr.bf16.mxu0 %v1491_v37  ;;  %1551 = vmatprep.subr.bf16.mxu1 %v1491_v37  ;;  %v1493_v57 = vpack.c.bf16 %v557_v50, %v556_v20  ;;  %v1319_v1 = vsel %vm478_vm10, 1.0, %v2656_v49  ;;  %v1320_v18 = vsel %vm479_vm11, 1.0, %v2656_v49  ;;  %vm362_vm12 = vcmp.eq.s32.totalorder %v2091_v56, %v1930_v6 }
  0x32   : >> { %1663 = vxpose.xlu0.b32.cont [3/16] (narrow) %v1662_v0, 32  ;;  %v1684_v61 = vpack.i.bf16 %v2172_v36, %v2178_v38  ;;  %v574_v35 = vsub.f32 %v1287_v17, %v1319_v1  ;;  %v327_v0 = vadd.s32 %v2050_v39, %v1921_v4  ;;  %v575_v51 = vsub.f32 %v1288_v34, %v1320_v18 }
  0x33   : >> { %1494 = vmatpush3.bf16.msra.mxu0 %v1493_v57  ;;  %v1271_v37 = vsel %vm362_vm12, 1.0, %v2656_v49  ;;  %vm462_vm13 = vcmp.eq.s32.totalorder %v2091_v56, %v1944_v11  ;;  %v344_v55 = vadd.s32 %v2050_v39, %v1980_v23  ;;  %1559 = vmatpush3.bf16.msra.mxu1 %v1493_v57  ;;  %v2657_v17 = vpack.i.bf16 %v2075_v52, %v2078_v53 }
  0x34   : >> { %vm363_vm14 = vcmp.eq.s32.totalorder %v327_v0, %v1930_v6  ;;  %vm463_vm15 = vcmp.eq.s32.totalorder %v327_v0, %v1944_v11  ;;  %v1303_v19 = vsel %vm462_vm13, 1.0, %v2656_v49  ;;  %v345_v34 = vadd.s32 %v2050_v39, %v1983_v24 }
  0x35   : >> { %v1495_v20 = vpack.c.bf16 %v575_v51, %v574_v35  ;;  %v1272_v56 = vsel %vm363_vm14, 1.0, %v2656_v49  ;;  %v1304_v50 = vsel %vm463_vm15, 1.0, %v2656_v49  ;;  %v558_v1 = vsub.f32 %v1271_v37, %v1303_v19 }
  0x36   : >> { %1665 = vxpose.xlu0.b32.cont [4/16] (narrow) %v2657_v17, 32  ;;  %v559_v57 = vsub.f32 %v1272_v56, %v1304_v50  ;;  %vm380_vm0 = vcmp.eq.s32.totalorder %v344_v55, %v1930_v6  ;;  %vm381_vm1 = vcmp.eq.s32.totalorder %v345_v34, %v1930_v6  ;;  %vm480_vm2 = vcmp.eq.s32.totalorder %v344_v55, %v1944_v11 }
  0x37   : >> { %1496 = vmatprep.subr.bf16.mxu0 %v1495_v20  ;;  %v1289_v52 = vsel %vm380_vm0, 1.0, %v2656_v49  ;;  %v1290_v53 = vsel %vm381_vm1, 1.0, %v2656_v49  ;;  %vm481_vm3 = vcmp.eq.s32.totalorder %v345_v34, %v1944_v11  ;;  %v1321_v18 = vsel %vm480_vm2, 1.0, %v2656_v49  ;;  %1552 = vmatprep.subr.bf16.mxu1 %v1495_v20 }
  0x38   : >> { %v2658_v35 = vpack.i.bf16 %v2081_v54, %v2094_v58  ;;  %v1497_v0 = vpack.c.bf16 %v559_v57, %v558_v1  ;;  %v1322_v51 = vsel %vm481_vm3, 1.0, %v2656_v49  ;;  %v576_v37 = vsub.f32 %v1289_v52, %v1321_v18 }
  0x39   : >> { %v328_v55 = vadd.s32 %v2050_v39, %v1924_v5  ;;  %v577_v17 = vsub.f32 %v1290_v53, %v1322_v51  ;;  %v329_v19 = vadd.s32 %v2050_v39, %v1933_v7  ;;  %v346_v34 = vadd.s32 %v2050_v39, %v1986_v25 }
  0x3a   : >> { %1667 = vxpose.xlu0.b32.cont [5/16] (narrow) %v2658_v35, 32  ;;  %v347_v20 = vadd.s32 %v2050_v39, %v1989_v26  ;;  %1498 = vmatpush3.bf16.msra.mxu0 %v1497_v0  ;;  %v330_v54 = vadd.s32 %v2050_v39, %v1936_v8  ;;  %v2659_v50 = vpack.i.bf16 %v2097_v59, %v2100_v60 }
  0x3b   : >> { %vm364_vm4 = vcmp.eq.s32.totalorder %v328_v55, %v1930_v6  ;;  %vm464_vm5 = vcmp.eq.s32.totalorder %v328_v55, %v1944_v11  ;;  %1560 = vmatpush3.bf16.msra.mxu1 %v1497_v0  ;;  %v1499_v58 = vpack.c.bf16 %v577_v17, %v576_v37  ;;  %vm365_vm6 = vcmp.eq.s32.totalorder %v329_v19, %v1930_v6 }
  0x3c   : >> { %v1273_v56 = vsel %vm364_vm4, 1.0, %v2656_v49  ;;  %vm465_vm7 = vcmp.eq.s32.totalorder %v329_v19, %v1944_v11  ;;  %v1274_v1 = vsel %vm365_vm6, 1.0, %v2656_v49  ;;  %v1305_v57 = vsel %vm464_vm5, 1.0, %v2656_v49 }
  0x3d   : >> { %v1306_v52 = vsel %vm465_vm7, 1.0, %v2656_v49  ;;  %vm382_vm8 = vcmp.eq.s32.totalorder %v346_v34, %v1930_v6  ;;  %1500 = vmatprep.subr.bf16.mxu0 %v1499_v58  ;;  %v560_v53 = vsub.f32 %v1273_v56, %v1305_v57  ;;  %vm383_vm9 = vcmp.eq.s32.totalorder %v347_v20, %v1930_v6  ;;  %1553 = vmatprep.subr.bf16.mxu1 %v1499_v58 }
  0x3e   : >> { %1669 = vxpose.xlu0.b32.cont [6/16] (narrow) %v2659_v50, 32  ;;  %v561_v18 = vsub.f32 %v1274_v1, %v1306_v52  ;;  %v1291_v35 = vsel %vm382_vm8, 1.0, %v2656_v49  ;;  %v1292_v0 = vsel %vm383_vm9, 1.0, %v2656_v49  ;;  %vm482_vm10 = vcmp.eq.s32.totalorder %v346_v34, %v1944_v11 }
  0x3f   : >> { %vm483_vm11 = vcmp.eq.s32.totalorder %v347_v20, %v1944_v11  ;;  %v331_v59 = vadd.s32 %v2050_v39, %v1939_v9  ;;  %v1323_v51 = vsel %vm482_vm10, 1.0, %v2656_v49  ;;  %vm366_vm12 = vcmp.eq.s32.totalorder %v330_v54, %v1930_v6 }
  0x40   : >> { %v1501_v60 = vpack.c.bf16 %v561_v18, %v560_v53  ;;  %v1324_v37 = vsel %vm483_vm11, 1.0, %v2656_v49  ;;  %v2660_v55 = vpack.i.bf16 %v2110_v41, %v2113_v42  ;;  %v578_v17 = vsub.f32 %v1291_v35, %v1323_v51 }
  0x41   : >> { %v579_v19 = vsub.f32 %v1292_v0, %v1324_v37  ;;  %vm367_vm13 = vcmp.eq.s32.totalorder %v331_v59, %v1930_v6  ;;  %v1275_v34 = vsel %vm366_vm12, 1.0, %v2656_v49  ;;  %vm466_vm14 = vcmp.eq.s32.totalorder %v330_v54, %v1944_v11 }
  0x42   : >> { %1671 = vxpose.xlu0.b32.cont [7/16] (narrow) %v2660_v55, 32  ;;  %1502 = vmatpush3.bf16.msra.mxu0 %v1501_v60  ;;  %v1276_v20 = vsel %vm367_vm13, 1.0, %v2656_v49  ;;  %vm467_vm15 = vcmp.eq.s32.totalorder %v331_v59, %v1944_v11  ;;  %v348_v58 = vadd.s32 %v2050_v39, %v1992_v27  ;;  %v1307_v41 = vsel %vm466_vm14, 1.0, %v2656_v49 }
  0x43   : >> { %1561 = vmatpush3.bf16.msra.mxu1 %v1501_v60  ;;  %v1503_v56 = vpack.c.bf16 %v579_v19, %v578_v17  ;;  %v1308_v42 = vsel %vm467_vm15, 1.0, %v2656_v49  ;;  %v349_v50 = vadd.s32 %v2050_v39, %v1995_v28  ;;  %v562_v1 = vsub.f32 %v1275_v34, %v1307_v41 }
  0x44   : >> { %v563_v57 = vsub.f32 %v1276_v20, %v1308_v42  ;;  %vm384_vm0 = vcmp.eq.s32.totalorder %v348_v58, %v1930_v6  ;;  %vm484_vm1 = vcmp.eq.s32.totalorder %v348_v58, %v1944_v11  ;;  %v2661_v54 = vpack.i.bf16 %v2116_v45, %v2123_v47 }
  0x45   : >> { %1504 = vmatprep.subr.bf16.mxu0 %v1503_v56  ;;  %vm385_vm2 = vcmp.eq.s32.totalorder %v349_v50, %v1930_v6  ;;  %v1293_v52 = vsel %vm384_vm0, 1.0, %v2656_v49  ;;  %vm485_vm3 = vcmp.eq.s32.totalorder %v349_v50, %v1944_v11  ;;  %v1325_v53 = vsel %vm484_vm1, 1.0, %v2656_v49  ;;  %1554 = vmatprep.subr.bf16.mxu1 %v1503_v56 }
  0x46   : >> { %1673 = vxpose.xlu0.b32.cont [8/16] (narrow) %v2661_v54, 32  ;;  %v1505_v18 = vpack.c.bf16 %v563_v57, %v562_v1  ;;  %v1294_v35 = vsel %vm385_vm2, 1.0, %v2656_v49  ;;  %v1326_v0 = vsel %vm485_vm3, 1.0, %v2656_v49  ;;  %v580_v59 = vsub.f32 %v1293_v52, %v1325_v53 }
  0x47   : >> { %v581_v60 = vsub.f32 %v1294_v35, %v1326_v0  ;;  %v332_v45 = vadd.s32 %v2050_v39, %v1942_v10  ;;  %v333_v47 = vadd.s32 %v2050_v39, %v1947_v12  ;;  %v350_v51 = vadd.s32 %v2050_v39, %v1998_v29 }
  0x48   : >> { %1506 = vmatpush3.bf16.msra.mxu0 %v1505_v18  ;;  %v351_v37 = vadd.s32 %v2050_v39, %v2001_v30  ;;  %1562 = vmatpush3.bf16.msra.mxu1 %v1505_v18  ;;  %v334_v55 = vadd.s32 %v2050_v39, %v1950_v13  ;;  %v335_v17 = vadd.s32 %v2050_v39, %v1953_v14  ;;  %v1003_v14 = vld [vmem:[%s2625_s4 + $0x8] sm:$0xff] (%p281_p11)  ;;  %v755_v27 = vadd.s32 (%p281_p11), 512, %v1921_v4 }
  0x49   : >> { %v2662_v19 = vpack.i.bf16 %v2126_v48, %v2129_v40  ;;  %v1507_v34 = vpack.c.bf16 %v581_v60, %v580_v59  ;;  %vm368_vm4 = vcmp.eq.s32.totalorder %v332_v45, %v1930_v6  ;;  %vm369_vm5 = vcmp.eq.s32.totalorder %v333_v47, %v1930_v6 }
  0x4a   : >> { %vm468_vm6 = vcmp.eq.s32.totalorder %v332_v45, %v1944_v11  ;;  %v1277_v20 = vsel %vm368_vm4, 1.0, %v2656_v49  ;;  %v1278_v58 = vsel %vm369_vm5, 1.0, %v2656_v49  ;;  %vm469_vm7 = vcmp.eq.s32.totalorder %v333_v47, %v1944_v11 }
  0x4b   : >> { %1675 = vxpose.xlu0.b32.cont [9/16] (narrow) %v2662_v19, 32  ;;  %v1309_v56 = vsel %vm468_vm6, 1.0, %v2656_v49  ;;  %1508 = vmatprep.subr.bf16.mxu0 %v1507_v34  ;;  %v1310_v41 = vsel %vm469_vm7, 1.0, %v2656_v49  ;;  %vm386_vm8 = vcmp.eq.s32.totalorder %v350_v51, %v1930_v6  ;;  %vm387_vm9 = vcmp.eq.s32.totalorder %v351_v37, %v1930_v6 }
  0x4c   : >> { %v564_v40 = vsub.f32 %v1277_v20, %v1309_v56  ;;  %1555 = vmatprep.subr.bf16.mxu1 %v1507_v34  ;;  %v565_v48 = vsub.f32 %v1278_v58, %v1310_v41  ;;  %v1295_v42 = vsel %vm386_vm8, 1.0, %v2656_v49  ;;  %v1296_v50 = vsel %vm387_vm9, 1.0, %v2656_v49 }
  0x4d   : >> { %vm486_vm10 = vcmp.eq.s32.totalorder %v350_v51, %v1944_v11  ;;  %v2663_v1 = vpack.i.bf16 %v2138_v21, %v2141_v22  ;;  %vm487_vm11 = vcmp.eq.s32.totalorder %v351_v37, %v1944_v11  ;;  %vm370_vm12 = vcmp.eq.s32.totalorder %v334_v55, %v1930_v6 }
  0x4e   : >> { %v1327_v57 = vsel %vm486_vm10, 1.0, %v2656_v49  ;;  %vm371_vm13 = vcmp.eq.s32.totalorder %v335_v17, %v1930_v6  ;;  %v1509_v54 = vpack.c.bf16 %v565_v48, %v564_v40  ;;  %v1328_v52 = vsel %vm487_vm11, 1.0, %v2656_v49 }
  0x4f   : >> { %1677 = vxpose.xlu0.b32.cont [10/16] (narrow) %v2663_v1, 32  ;;  %v582_v53 = vsub.f32 %v1295_v42, %v1327_v57  ;;  %v1279_v18 = vsel %vm370_vm12, 1.0, %v2656_v49  ;;  %v583_v35 = vsub.f32 %v1296_v50, %v1328_v52  ;;  %v1280_v0 = vsel %vm371_vm13, 1.0, %v2656_v49  ;;  %v2666_v50 = vld [vmem:[#allocation14_spill] sm:$0xff] }
  0x50   : >> { %vm470_vm14 = vcmp.eq.s32.totalorder %v334_v55, %v1944_v11  ;;  %vm471_vm15 = vcmp.eq.s32.totalorder %v335_v17, %v1944_v11  ;;  %1510 = vmatpush3.bf16.msra.mxu0 %v1509_v54  ;;  %v352_v59 = vadd.s32 %v2050_v39, %v2004_v31  ;;  %v353_v60 = vadd.s32 %v2050_v39, %v2007_v32  ;;  %v743_v32 = vld [vmem:[%s2624_s3 + $0x210] sm:$0xff] (%p281_p11) }
  0x51   : >> { %v1311_v21 = vsel %vm470_vm14, 1.0, %v2656_v49  ;;  %v1312_v22 = vsel %vm471_vm15, 1.0, %v2656_v49  ;;  %1563 = vmatpush3.bf16.msra.mxu1 %v1509_v54  ;;  %v2664_v45 = vpack.i.bf16 %v2144_v3, %v2150_v46  ;;  %v1511_v47 = vpack.c.bf16 %v583_v35, %v582_v53  ;;  %v305_v53 = vld [vmem:[%s2048_s7 + $0x70] sm:$0xff] }
  0x52   : >> { %v566_v51 = vsub.f32 %v1279_v18, %v1311_v21  ;;  %v567_v37 = vsub.f32 %v1280_v0, %v1312_v22  ;;  %v336_v55 = vadd.s32 %v2050_v39, %v1956_v15  ;;  %vm388_vm0 = vcmp.eq.s32.totalorder %v352_v59, %v1930_v6  ;;  %v321_v18 = vld [vmem:[%s2048_s7 + $0xf0] sm:$0xff] }
  0x53   : >> { %1679 = vxpose.xlu0.b32.cont [11/16] (narrow) %v2664_v45, 32  ;;  %vm389_vm1 = vcmp.eq.s32.totalorder %v353_v60, %v1930_v6  ;;  %vm488_vm2 = vcmp.eq.s32.totalorder %v352_v59, %v1944_v11  ;;  %vm489_vm3 = vcmp.eq.s32.totalorder %v353_v60, %v1944_v11  ;;  %1512 = vmatprep.subr.bf16.mxu0 %v1511_v47  ;;  %v1297_v19 = vsel %vm388_vm0, 1.0, %v2656_v49  ;;  %v2667_v45 = vld [vmem:[#allocation8_spill] sm:$0xff] }
  0x54   : >> { %v1513_v17 = vpack.c.bf16 %v567_v37, %v566_v51  ;;  %v1298_v3 = vsel %vm389_vm1, 1.0, %v2656_v49  ;;  %v1329_v46 = vsel %vm488_vm2, 1.0, %v2656_v49  ;;  %1556 = vmatprep.subr.bf16.mxu1 %v1511_v47  ;;  %v1330_v34 = vsel %vm489_vm3, 1.0, %v2656_v49 }
  0x55   : >> { %v584_v20 = vsub.f32 %v1297_v19, %v1329_v46  ;;  %v337_v58 = vadd.s32 %v2050_v39, %v1959_v16  ;;  %vm372_vm4 = vcmp.eq.s32.totalorder %v336_v55, %v1930_v6  ;;  %v2665_v56 = vpack.i.bf16 %v2153_v43, %v2156_v44 }
  0x56   : >> { %1514 = vmatpush3.bf16.msra.mxu0 %v1513_v17  ;;  %v585_v41 = vsub.f32 %v1298_v3, %v1330_v34  ;;  %v1281_v40 = vsel %vm372_vm4, 1.0, %v2656_v49  ;;  %vm472_vm5 = vcmp.eq.s32.totalorder %v336_v55, %v1944_v11  ;;  %v354_v48 = vadd.s32 %v2050_v39, %v2010_v33  ;;  %1564 = vmatpush3.bf16.msra.mxu1 %v1513_v17  ;;  %v306_v17 = vld [vmem:[%s2048_s7 + $0x78] sm:$0xff]  ;;  %v1004_v33 = vld [vmem:[%s2625_s4 + $0x10] sm:$0xff] (%p281_p11) }
  0x57   : >> { %1681 = vxpose.xlu0.b32.cont [12/16] (narrow) %v2665_v56, 32  ;;  %vm373_vm6 = vcmp.eq.s32.totalorder %v337_v58, %v1930_v6  ;;  %vm473_vm7 = vcmp.eq.s32.totalorder %v337_v58, %v1944_v11  ;;  %v1313_v42 = vsel %vm472_vm5, 1.0, %v2656_v49  ;;  %v355_v43 = vadd.s32 %v2050_v39, %v2666_v50 }
  0x58   : >> { %v1515_v44 = vpack.c.bf16 %v585_v41, %v584_v20  ;;  %v1282_v1 = vsel %vm373_vm6, 1.0, %v2656_v49  ;;  %v1314_v57 = vsel %vm473_vm7, 1.0, %v2656_v49  ;;  %v568_v54 = vsub.f32 %v1281_v40, %v1313_v42 }
  0x59   : >> { %v569_v52 = vsub.f32 %v1282_v1, %v1314_v57  ;;  %vm390_vm8 = vcmp.eq.s32.totalorder %v354_v48, %v1930_v6  ;;  %vm391_vm9 = vcmp.eq.s32.totalorder %v355_v43, %v1930_v6  ;;  %vm490_vm10 = vcmp.eq.s32.totalorder %v354_v48, %v1944_v11 }
  0x5a   : >> { %1516 = vmatprep.subr.bf16.mxu0 %v1515_v44  ;;  %v1299_v35 = vsel %vm390_vm8, 1.0, %v2656_v49  ;;  %v1300_v0 = vsel %vm391_vm9, 1.0, %v2656_v49  ;;  %vm491_vm11 = vcmp.eq.s32.totalorder %v355_v43, %v1944_v11  ;;  %v1331_v21 = vsel %vm490_vm10, 1.0, %v2656_v49  ;;  %1557 = vmatprep.subr.bf16.mxu1 %v1515_v44 }
  0x5b   : >> { %1683 = vxpose.xlu0.b32.cont [13/16] (narrow) %v1682_v2, 32  ;;  %v1517_v22 = vpack.c.bf16 %v569_v52, %v568_v54  ;;  %v1332_v59 = vsel %vm491_vm11, 1.0, %v2656_v49  ;;  %v586_v60 = vsub.f32 %v1299_v35, %v1331_v21  ;;  %v338_v62 = vadd.s32 %v2050_v39, %v2667_v45  ;;  %v2668_v2 = vld [vmem:[#allocation9_spill] sm:$0xff] }
  0x5c   : >> { %v587_v63 = vsub.f32 %v1300_v0, %v1332_v59  ;;  %v339_v47 = vadd.s32 %v2050_v39, %v2668_v2  ;;  %v1686_v51 = vpack.i.bf16 %v305_v53, %v321_v18  ;;  %v322_v39 = vld [vmem:[%s2048_s7 + $0xf8] sm:$0xff]  ;;  %v2669_v53 = vld [vmem:[#allocation18_spill] sm:$0xff]  ;;  %v1817_v15 = vmov (%p281_p11), 0.0   ;;  %s1712_s7 = scalar_lea.vmem (%p281_p11), %s2578_s17, 16 }
  0x5d   : >> { %1518 = vmatpush3.bf16.msra.mxu0 %v1517_v22  ;;  %vm374_vm12 = vcmp.eq.s32.totalorder %v338_v62, %v1930_v6  ;;  %vm474_vm13 = vcmp.eq.s32.totalorder %v338_v62, %v1944_v11  ;;  %1565 = vmatpush3.bf16.msra.mxu1 %v1517_v22  ;;  %v1688_v36 = vpack.i.bf16 %v306_v17, %v322_v39  ;;  %v2671_v22 = vld [vmem:[#allocation17_spill] sm:$0xff]  ;;  %v2675_v17 = vld [vmem:[#allocation15_spill] sm:$0xff]  ;;  %v756_v30 = vadd.s32 (%p281_p11), 512, %v1924_v5  ;;  %p1713_p12 = scmp.ne.s32.totalorder (%p281_p11), %s2578_s17, %s1712_s7  ;;  %p1720_p2 = scmp.lt.s32.totalorder (%p281_p11), %s1718_s10, %s1712_s7 }
  0x5e   : >> { %v1519_v37 = vpack.c.bf16 %v587_v63, %v586_v60  ;;  %vm375_vm14 = vcmp.eq.s32.totalorder %v339_v47, %v1930_v6  ;;  %v1283_v55 = vsel %vm374_vm12, 1.0, %v2656_v49  ;;  %vm475_vm15 = vcmp.eq.s32.totalorder %v339_v47, %v1944_v11  ;;  %v2673_v63 = vld [vmem:[#allocation16_spill] sm:$0xff] }
  0x5f   : >> { %1685 = vxpose.xlu0.b32.cont [14/16] (narrow) %v1684_v61, 32  ;;  %v1284_v19 = vsel %vm375_vm14, 1.0, %v2656_v49  ;;  %v1315_v3 = vsel %vm474_vm13, 1.0, %v2656_v49  ;;  %v1316_v46 = vsel %vm475_vm15, 1.0, %v2656_v49  ;;  %v757_v31 = vadd.s32 (%p281_p11), 512, %v1933_v7  ;;  %p1714_p13 = pnand (%p281_p11), %p1713_p12, %p1889_p5  ;;  %p1721_p3 = por (%p281_p11), %p1720_p2, %p1719_p1 }
  0x60   : >> { %1520 = vmatprep.subr.bf16.mxu0 %v1519_v37  ;;  %v570_v34 = vsub.f32 %v1283_v55, %v1315_v3  ;;  %v571_v20 = vsub.f32 %v1284_v19, %v1316_v46  ;;  %1558 = vmatprep.subr.bf16.mxu1 %v1519_v37  ;;  %v741_v19 = vld [vmem:[%s2624_s3 + $0x200] sm:$0xff] (%p281_p11)  ;;  %vm770_vm6 = vcmp.eq.s32.totalorder (%p281_p11), %v755_v27, %v1930_v6 }
  0x61   : > { %v1002_v3 = vld [vmem:[%s2625_s4] sm:$0xff] (%p281_p11)  ;;  %vm807_vm7 = vcmp.eq.s32.totalorder (%p281_p11), %v755_v27, %v1944_v11  ;;  %vm771_vm8 = vcmp.eq.s32.totalorder (%p281_p11), %v756_v30, %v1930_v6  ;;  %vm772_vm9 = vcmp.eq.s32.totalorder (%p281_p11), %v757_v31, %v1930_v6  ;;  %vm808_vm10 = vcmp.eq.s32.totalorder (%p281_p11), %v756_v30, %v1944_v11  ;;  %p1715_p0 = pneg (%p281_p11), %p1714_p13 }
  0x62   : >> { %v1521_v38 = vpack.c.bf16 %v571_v20, %v570_v34  ;;  %v2681_v46 = vld [vmem:[#allocation5_spill] sm:$0xff] (%p281_p11)  ;;  %v2682_v20 = vld [vmem:[#allocation6_spill] sm:$0xff] (%p281_p11)  ;;  %1007 = vxpose.xlu1.b32.start [1/5] (short) (narrow) (%p281_p11), %v1002_v3, 32  ;;  %v1347_v7 = vsel (%p281_p11), %vm807_vm7, 1.0, %v1817_v15  ;;  %vm809_vm11 = vcmp.eq.s32.totalorder (%p281_p11), %v757_v31, %v1944_v11  ;;  %v1818_v3 = vmov (%p281_p11), 1.0|1.0  }
  0x63   : >> { %1687 = vxpose.xlu0.b32.cont [15/16] (narrow) %v1686_v51, 32  ;;  %v752_v34 = vadd.s32 (%p281_p11), 512, %v2681_v46  ;;  %p1722_p4 = pnand (%p281_p11), %p1721_p3, %p1715_p0 }
  0x64   : >> { %1522 = vmatpush3.bf16.msra.mxu0 %v1521_v38  ;;  %1566 = vmatpush3.bf16.msra.mxu1 %v1521_v38 }
  0x65   : > { %vm767_vm0 = vcmp.eq.s32.totalorder (%p281_p11), %v752_v34, %v1930_v6  ;;  %vm804_vm2 = vcmp.eq.s32.totalorder (%p281_p11), %v752_v34, %v1944_v11  ;;  %v746_v34 = vld [vmem:[%s2624_s3 + $0x228] sm:$0xff] (%p281_p11) }
  0x66   : > { %v1333_v16 = vsel (%p281_p11), %vm767_vm0, 1.0, %v1817_v15  ;;  %v1344_v24 = vsel (%p281_p11), %vm804_vm2, 1.0, %v1817_v15  ;;  %1008 = vxpose.xlu1.b32.cont [2/5] (short) (narrow) (%p281_p11), %v1003_v14, 32 }
  0x67   : >> { %1689 = vxpose.xlu0.b32.end [16/16] (narrow) %v1688_v36, 32  ;;  %v837_v26 = vsub.f32 (%p281_p11), %v1333_v16, %v1344_v24  ;;  %v1819_v16 = vmov (%p281_p11), 1.0   ;;  %v751_v24 = vld [vmem:[%s2624_s3 + $0x250] sm:$0xff] (%p281_p11) }
  0x6a   : > { %1009 = vxpose.xlu1.b32.cont [3/5] (short) (narrow) (%p281_p11), %v1004_v33, 32 }
  0x6b   : > { %848 = vxpose.xlu0.b32.start [1/11] (short) (narrow) (%p281_p11), %v741_v19, 32 }
  0xab   : >> { %v1690_v61 = vpop.trf.xlu0 }
  0xac   : >> { %v1691_v58 = vunpack.i.l.bf16 %v1690_v61  ;;  %v1694_v56 = vunpack.i.h.bf16 %v1690_v61  ;;  %v2683_v61 = vld [vmem:[#allocation7_spill] sm:$0xff] (%p281_p11) }
  0xae   : >> { %716 = vmatprep.mubr.f32.mxu0 %v1691_v58  ;;  %v754_v58 = vadd.s32 (%p281_p11), 512, %v2683_v61 }
  0xaf   : >> { %v1695_v41 = vpop.trf.xlu0  ;;  %717 = vmatmul.mubr.f32.vlgmr.msra.gmra.mrb[0].mxu0 %v1694_v56  ;;  %v742_v56 = vld [vmem:[%s2624_s3 + $0x208] sm:$0xff] (%p281_p11) }
  0xb0   : >> { %v1696_v40 = vunpack.i.l.bf16 %v1695_v41  ;;  %v1699_v48 = vunpack.i.h.bf16 %v1695_v41  ;;  %vm769_vm4 = vcmp.eq.s32.totalorder (%p281_p11), %v754_v58, %v1930_v6  ;;  %849 = vxpose.xlu0.b32.cont [2/11] (short) (narrow) (%p281_p11), %v742_v56, 32  ;;  %vm806_vm5 = vcmp.eq.s32.totalorder (%p281_p11), %v754_v58, %v1944_v11 }
  0xb1   : > { %v1335_v28 = vsel (%p281_p11), %vm769_vm4, 1.0, %v1817_v15 }
  0xb2   : >> { %721 = vmatprep.mubr.f32.mxu0 %v1696_v40  ;;  %v1336_v40 = vsel (%p281_p11), %vm770_vm6, 1.0, %v1817_v15 }
  0xb3   : >> { %v1700_v49 = vpop.trf.xlu0  ;;  %722 = vmatmul.mubr.f32.gmra.mrb[2].mxu0 %v1699_v48 }
  0xb4   : >> { %v1701_v42 = vunpack.i.l.bf16 %v1700_v49  ;;  %v1704_v50 = vunpack.i.h.bf16 %v1700_v49  ;;  %v840_v49 = vsub.f32 (%p281_p11), %v1336_v40, %v1347_v7  ;;  %850 = vxpose.xlu0.b32.cont [3/11] (short) (narrow) (%p281_p11), %v743_v32, 32 }
  0xb6   : >> { %726 = vmatprep.mubr.f32.mxu1 %v1701_v42  ;;  %v2469_v42 = vld [vmem:[%s240_s12] ss:$0 sm:$0xff] (%p281_p11) }
  0xb7   : >> { %v1705_v43 = vpop.trf.xlu0  ;;  %727 = vmatmul.mubr.f32.vlgmr.msra.gmra.mrb[0].mxu1 %v1704_v50  ;;  %v1338_v50 = vsel (%p281_p11), %vm772_vm9, 1.0, %v1817_v15  ;;  %vm987_vm14 = vcmp.eq.s32.totalorder (%p281_p11), %v2681_v46, %v2469_v42  ;;  %vm990_vm4 = vcmp.eq.s32.totalorder (%p281_p11), %v1921_v4, %v2469_v42 }
  0xb8   : >> { %v1709_v44 = vunpack.i.h.bf16 %v1705_v43  ;;  %v1706_v1 = vunpack.i.l.bf16 %v1705_v43  ;;  %v1348_v43 = vsel (%p281_p11), %vm808_vm10, 1.0, %v1817_v15 }
  0xba   : >> { %731 = vmatprep.mubr.f32.mxu1 %v1706_v1  ;;  %v1005_v1 = vld [vmem:[%s2625_s4 + $0x18] sm:$0xff] (%p281_p11) }
  0xbb   : >> { %732 = vmatmul.mubr.f32.gmra.mrb[2].mxu1 %v1709_v44  ;;  %v744_v44 = vld [vmem:[%s2624_s3 + $0x218] sm:$0xff] (%p281_p11)  ;;  %1010 = vxpose.xlu1.b32.cont [4/5] (short) (narrow) (%p281_p11), %v1005_v1, 32 }
  0xbc   : > { %851 = vxpose.xlu0.b32.cont [4/11] (short) (narrow) (%p281_p11), %v744_v44, 32 }
 0x182   : >> { %v1411_v57 = vpop.f32.mrb[0].mxu0 }
 0x183   : >> { %v1412_v54 = vpop.f32.mrb[1].mxu0 }
 0x184   : >> { %v1413_v52 = vadd.f32 %v1412_v54, %v1411_v57  ;;  %v1349_v54 = vsel (%p281_p11), %vm809_vm11, 1.0, %v1817_v15 }
 0x186   : >> { %v2394_v38 = vadd.f32 %v2669_v53, %v1413_v52   ;;  %v1414_v35 = vpop.f32.mrb[2].mxu0  ;;  %v759_v53 = vadd.s32 (%p281_p11), 512, %v1939_v9 }
 0x187   : >> { %v1415_v0 = vpop.f32.mrb[3].mxu0 }
 0x188   : >> { %v2670_v18 = vmov %v2394_v38  ;;  %v1416_v21 = vadd.f32 %v1415_v0, %v1414_v35  ;;  %vm774_vm15 = vcmp.eq.s32.totalorder (%p281_p11), %v759_v53, %v1930_v6  ;;  %vm811_vm0 = vcmp.eq.s32.totalorder (%p281_p11), %v759_v53, %v1944_v11 }
 0x189   : >> { %v2680_v38 = vmov %v2670_v18 }
 0x18a   : >> { %v2397_v37 = vadd.f32 %v2671_v22, %v1416_v21   ;;  %v1417_v60 = vpop.f32.mrb[0].mxu1  ;;  %v753_v38 = vadd.s32 (%p281_p11), 512, %v2682_v20  ;;  %v1340_v22 = vsel (%p281_p11), %vm774_vm15, 1.0, %v1817_v15 }
 0x18b   : >> { %v1418_v45 = vpop.f32.mrb[1].mxu1 }
 0x18c   : >> { %v2672_v59 = vmov %v2397_v37  ;;  %v1419_v62 = vadd.f32 %v1418_v45, %v1417_v60  ;;  %vm768_vm1 = vcmp.eq.s32.totalorder (%p281_p11), %v753_v38, %v1930_v6  ;;  %vm805_vm3 = vcmp.eq.s32.totalorder (%p281_p11), %v753_v38, %v1944_v11 }
 0x18d   : >> { %v2679_v37 = vmov %v2672_v59  ;;  %v1334_v23 = vsel (%p281_p11), %vm768_vm1, 1.0, %v1817_v15  ;;  %v1345_v25 = vsel (%p281_p11), %vm805_vm3, 1.0, %v1817_v15  ;;  %v1351_v60 = vsel (%p281_p11), %vm811_vm0, 1.0, %v1817_v15 }
 0x18e   : >> { %v2400_v36 = vadd.f32 %v2673_v63, %v1419_v62   ;;  %v1420_v47 = vpop.f32.mrb[2].mxu1  ;;  %v838_v29 = vsub.f32 (%p281_p11), %v1334_v23, %v1345_v25  ;;  %v1346_v37 = vsel (%p281_p11), %vm806_vm5, 1.0, %v1817_v15  ;;  %v745_v62 = vld [vmem:[%s2624_s3 + $0x220] sm:$0xff] (%p281_p11)  ;;  %vm988_vm1 = vcmp.eq.s32.totalorder (%p281_p11), %v2682_v20, %v2469_v42  ;;  %v750_v23 = vld [vmem:[%s2624_s3 + $0x248] sm:$0xff] (%p281_p11) }
 0x18f   : >> { %v1421_v51 = vpop.f32.mrb[3].mxu1  ;;  %283 = sbr.rel (!%p281_p11) target bundleno = 36 (0x24), region = 89  ;;  %v839_v48 = vsub.f32 (%p281_p11), %v1335_v28, %v1346_v37  ;;  %v1006_v63 = vld [vmem:[%s2625_s4 + $0x20] sm:$0xff] (%p281_p11)  ;;  %vm2505_vm2 = vmpackc.low (%p281_p11), %vm988_vm1, %vm987_vm14  ;;  %vm989_vm3 = vcmp.eq.s32.totalorder (%p281_p11), %v2683_v61, %v2469_v42  ;;  %852 = vxpose.xlu0.b32.cont [5/11] (short) (narrow) (%p281_p11), %v745_v62, 32  ;;  %vm1039_vm14 = vcmask (%p281_p11), 326656  }
 0x190   : >> { %v2674_v2 = vmov %v2400_v36  ;;  %v1422_v55 = vadd.f32 %v1421_v51, %v1420_v47  ;;  %v1523_v41 = vpack.c.bf16 (%p281_p11), %v838_v29, %v837_v26  ;;  %v844_v47 = vsub.f32 (%p281_p11), %v1340_v22, %v1351_v60  ;;  %1544 = vmatprep.subr.msk.bf16.mxu0 (%p281_p11), %vm2505_vm2, %v1818_v3  ;;  %vm2518_vm7 = vmpackc.low (%p281_p11), %vm990_vm4, %vm989_vm3  ;;  %1011 = vxpose.xlu1.b32.end [5/5] (short) (narrow) (%p281_p11), %v1006_v63, 32 }
 0x191   : >> { %v2678_v36 = vmov %v2674_v2  ;;  %v1527_v57 = vpack.c.bf16 (%p281_p11), %v840_v49, %v839_v48  ;;  %v760_v51 = vadd.s32 (%p281_p11), 512, %v1942_v10  ;;  %1546 = vmatpush3.bf16.msk.msra.mxu0 (%p281_p11), %vm2505_vm2, %v1818_v3 }
 0x192   : >> { %v2403_v35 = vadd.f32 %v2675_v17, %v1422_v55   ;;  %v758_v36 = vadd.s32 (%p281_p11), 512, %v1936_v8  ;;  %v1337_v8 = vsel (%p281_p11), %vm771_vm8, 1.0, %v1817_v15  ;;  %1524 = vmatprep.subr.bf16.mxu1 (%p281_p11), %v1523_v41  ;;  %v761_v17 = vadd.s32 (%p281_p11), 512, %v1947_v12  ;;  %1548 = vmatprep.subr.msk.bf16.mxu0 (%p281_p11), %vm2518_vm7, %v1818_v3 }
 0x193   : > { %v841_v52 = vsub.f32 (%p281_p11), %v1337_v8, %v1348_v43  ;;  %1526 = vmatpush3.bf16.msra.mxu1 (%p281_p11), %v1523_v41  ;;  %vm775_vm5 = vcmp.eq.s32.totalorder (%p281_p11), %v760_v51, %v1930_v6  ;;  %vm812_vm6 = vcmp.eq.s32.totalorder (%p281_p11), %v760_v51, %v1944_v11  ;;  %v762_v12 = vadd.s32 (%p281_p11), 512, %v1950_v13  ;;  %853 = vxpose.xlu0.b32.cont [6/11] (short) (narrow) (%p281_p11), %v746_v34, 32 }
 0x194   : >> { %v2676_v39 = vmov %v2403_v35  ;;  %vm773_vm12 = vcmp.eq.s32.totalorder (%p281_p11), %v758_v36, %v1930_v6  ;;  %vm810_vm13 = vcmp.eq.s32.totalorder (%p281_p11), %v758_v36, %v1944_v11  ;;  %1528 = vmatprep.subr.bf16.mxu1 (%p281_p11), %v1527_v57  ;;  %vm776_vm8 = vcmp.eq.s32.totalorder (%p281_p11), %v761_v17, %v1930_v6 }
 0x195   : >> { %v2677_v35 = vmov %v2676_v39  ;;  %v1339_v0 = vsel (%p281_p11), %vm773_vm12, 1.0, %v1817_v15  ;;  %v1350_v21 = vsel (%p281_p11), %vm810_vm13, 1.0, %v1817_v15  ;;  %v1341_v4 = vsel (%p281_p11), %vm775_vm5, 1.0, %v1817_v15  ;;  %1550 = vmatpush3.bf16.msk.msra.mxu0 (%p281_p11), %vm2518_vm7, %v1818_v3 }
 0x196   : > { %v842_v35 = vsub.f32 %v1338_v50, %v1349_v54  ;;  %v843_v45 = vsub.f32 %v1339_v0, %v1350_v21  ;;  %vm813_vm9 = vcmp.eq.s32.totalorder %v761_v17, %v1944_v11  ;;  %v1352_v46 = vsel %vm812_vm6, 1.0, %v1817_v15 }
 0x197   : > { %1530 = vmatpush3.bf16.msra.mxu1 %v1527_v57  ;;  %v1342_v20 = vsel %vm776_vm8, 1.0, %v1817_v15  ;;  %v1353_v13 = vsel %vm813_vm9, 1.0, %v1817_v15  ;;  %v845_v38 = vsub.f32 %v1341_v4, %v1352_v46  ;;  %vm777_vm10 = vcmp.eq.s32.totalorder %v762_v12, %v1930_v6  ;;  %v747_v6 = vld [vmem:[%s2624_s3 + $0x230] sm:$0xff] }
 0x198   : > { %v1531_v9 = vpack.c.bf16 %v842_v35, %v841_v52  ;;  %v1535_v19 = vpack.c.bf16 %v844_v47, %v843_v45  ;;  %v846_v61 = vsub.f32 %v1342_v20, %v1353_v13  ;;  %vm814_vm11 = vcmp.eq.s32.totalorder %v762_v12, %v1944_v11  ;;  %854 = vxpose.xlu0.b32.cont [7/11] (short) (narrow) %v747_v6, 32 }
 0x199   : > { %vm991_vm12 = vcmp.eq.s32.totalorder %v1924_v5, %v2469_v42  ;;  %v1343_v56 = vsel %vm777_vm10, 1.0, %v1817_v15  ;;  %v1354_v14 = vsel %vm814_vm11, 1.0, %v1817_v15  ;;  %v748_v5 = vld [vmem:[%s2624_s3 + $0x238] sm:$0xff]  ;;  %v749_v15 = vld [vmem:[%s2624_s3 + $0x240] sm:$0xff]  ;;  %vm880_vm13 = vcmask 719872  }
 0x19a   : > { %1532 = vmatprep.subr.bf16.mxu1 %v1531_v9  ;;  %v1539_v58 = vpack.c.bf16 %v846_v61, %v845_v38  ;;  %1483 = vmatprep.subr.msk.mxu0 %vm991_vm12, %v1819_v16  ;;  %v847_v11 = vsub.f32 %v1343_v56, %v1354_v14 }
 0x19b   : > { %1534 = vmatpush3.bf16.msra.mxu1 %v1531_v9  ;;  %1484 = vmatpush3.msk.msra.mxu0 %vm991_vm12, %v1819_v16 }
 0x19c   : > { %1536 = vmatprep.subr.bf16.mxu1 %v1535_v19  ;;  %855 = vxpose.xlu0.b32.cont [8/11] (short) (narrow) %v748_v5, 32 }
 0x19f   : > { %1538 = vmatpush3.bf16.msra.mxu1 %v1535_v19 }
 0x1a0   : > { %1540 = vmatprep.subr.bf16.mxu1 %v1539_v58  ;;  %856 = vxpose.xlu0.b32.cont [9/11] (short) (narrow) %v749_v15, 32 }
 0x1a3   : > { %1542 = vmatpush3.bf16.msra.mxu1 %v1539_v58 }
 0x1a4   : > { %1467 = vmatprep.subr.mxu1 %v847_v11  ;;  %857 = vxpose.xlu0.b32.cont [10/11] (short) (narrow) %v750_v23, 32 }
 0x1a7   : > { %1468 = vmatpush3.msra.mxu1 %v847_v11 }
 0x1a8   : > { %858 = vxpose.xlu0.b32.end [11/11] (short) (narrow) %v751_v24, 32 }
 0x200   : > { %v864_v25 = vpop.trf.xlu0  ;;  %v1023_v26 = vpop.trf.xlu1 }
 0x201   : > { %1469 = vmatprep.mubr.msk.f32.mxu1 %vm880_vm13, %v864_v25  ;;  %1485 = vmatprep.mubr.msk.f32.mxu0 %vm1039_vm14, %v1023_v26 }
 0x204   : > { %v865_v27 = vpop.trf.xlu0  ;;  %v1024_v28 = vpop.trf.xlu1 }
 0x205   : > { %1470 = vmatmul.mubr.msk.f32.vlgmr.msra.gmra.mrb[0].mxu1 %vm880_vm13, %v865_v27  ;;  %1486 = vmatmul.mubr.msk.f32.vlgmr.msra.gmra.mrb[0].mxu0 %vm1039_vm14, %v1024_v28 }
 0x208   : > { %v866_v29 = vpop.trf.xlu0  ;;  %v1025_v30 = vpop.trf.xlu1 }
 0x209   : > { %1472 = vmatprep.mubr.msk.f32.mxu1 %vm880_vm13, %v866_v29  ;;  %1488 = vmatprep.mubr.msk.f32.mxu0 %vm1039_vm14, %v1025_v30 }
 0x20c   : > { %v867_v31 = vpop.trf.xlu0  ;;  %v1026_v32 = vpop.trf.xlu1 }
 0x20d   : > { %1473 = vmatmul.mubr.msk.f32.gmra.mrb[2].mxu1 %vm880_vm13, %v867_v31  ;;  %1489 = vmatmul.mubr.msk.f32.gmra.mrb[2].mxu0 %vm1039_vm14, %v1026_v32 }
 0x2d8   : > { %v1471_v33 = vpop.f32.mrb[0].mxu1  ;;  %v1487_v37 = vpop.f32.mrb[0].mxu0 }
 0x2d9   : > { %v979_v36 = vadd.f32 %v1471_v33, %v2672_v59  ;;  %v959_v41 = vpop.f32.mrb[1].mxu1  ;;  %v1118_v40 = vpop.f32.mrb[1].mxu0 }
 0x2da   : > { %v978_v7 = vadd.f32 %v959_v41, %v2670_v18 }
 0x2db   : > { %v1138_v48 = vadd.f32 %v1487_v37, %v979_v36 }
 0x2dc   : > { %v1137_v49 = vadd.f32 %v1118_v40, %v978_v7 }
 0x2dd   : > { %v1142_v42 = vmul.f32 %v1138_v48, %v1138_v48 }
 0x2de   : > { %v1141_v8 = vmul.f32 %v1137_v49, %v1137_v49 }
 0x2e0   : > { %v1145_v50 = vadd.f32 %v1142_v42, %v1141_v8  ;;  %v1474_v43 = vpop.f32.mrb[2].mxu1  ;;  %v1490_v44 = vpop.f32.mrb[2].mxu0 }
 0x2e1   : > { %v981_v1 = vadd.f32 %v1474_v43, %v2676_v39  ;;  %v969_v57 = vpop.f32.mrb[3].mxu1  ;;  %v1128_v54 = vpop.f32.mrb[3].mxu0 }
 0x2e2   : > { %v980_v52 = vadd.f32 %v969_v57, %v2674_v2 }
 0x2e3   : > { %v1140_v59 = vadd.f32 %v1490_v44, %v981_v1 }
 0x2e4   : > { %v1139_v53 = vadd.f32 %v1128_v54, %v980_v52 }
 0x2e5   : > { %v1144_v0 = vmul.f32 %v1140_v59, %v1140_v59 }
 0x2e6   : > { %v1143_v35 = vmul.f32 %v1139_v53, %v1139_v53 }
 0x2e8   : > { %v1146_v18 = vadd.f32 %v1145_v50, %v1143_v35 }
 0x2ea   : > { %v1147_v21 = vadd.f32 %v1146_v18, %v1144_v0 }
 0x2ec   : > { %v1148_v9 = vrot.slane %v1147_v21, 4 }
 0x2ee   : > { %v1149_v22 = vadd.f32 %v1148_v9, %v1147_v21 }
 0x2f0   : > { %v1150_v60 = vrot.slane %v1149_v22, 2 }
 0x2f2   : > { %v1151_v45 = vadd.f32 %v1150_v60, %v1149_v22 }
 0x2f4   : > { %v1152_v62 = vrot.slane %v1151_v45, 1 }
 0x2f6   : > { %v1153_v39 = vadd.f32 %v1152_v62, %v1151_v45 }
 0x2f8   : > { %1710 = vrsqrt.f32 %v1153_v39  ;;  %vm1156_vm15 = vcmp.eq.f32.partialorder %v1153_v39, inf  ;;  %v1159_v47 = vand.u32 2147483648, %v1153_v39  ;;  %vm1158_vm0 = vcmp.eq.f32.partialorder %v1153_v39, 0.0 }
 0x302   : > { %v1711_v63 = vpop.eup %1710 }
 0x303   : > { %v1155_v2 = vmul.f32 %v1711_v63, %v1153_v39 }
 0x305   : > { %v1157_v51 = vsel %vm1156_vm15, %v1153_v39, %v1155_v2 }
 0x306   : > { %v1160_v55 = vsel %vm1158_vm0, %v1159_v47, %v1157_v51 }
 0x307   : > { %1161 = vst [vmem:[%s2017_s16] sm:$0x1] %v1160_v55 }
 0x308   : > { %1725 = shalt.err (!%p1722_p4)
}
 0x309   : > { %s1726_s30 = scalar_lea.hbm %s2576_s26, 16  ;;  %s1730_s13 = scalar_lea.hbm %s2626_s5, 48 }
 0x30a   : > { %p1727_p7 = scmp.ne.s32.totalorder %s2576_s26, %s1726_s30  ;;  %p1731_p10 = scmp.lt.u32.totalorder %s2576_s26, %s2626_s5 }
 0x30b   : > { %p1732_p11 = scmp.lt.u32.totalorder %s1730_s13, %s1726_s30  ;;  %p1734_p13 = scmp.lt.u32.totalorder %s1726_s30, %s2576_s26 }
 0x30c   : > { %p1728_p8 = pnand %p1727_p7, %p1889_p5 }
 0x30d   : > { %p1733_p12 = por %p1732_p11, %p1731_p10 }
 0x30e   : > { %p1729_p9 = pneg %p1728_p8 }
 0x30f   : > { %p1735_p0 = por %p1734_p13, %p1733_p12 }
 0x311   : > { %p1736_p1 = pnand %p1735_p0, %p1729_p9 }
 0x313   : > { %1739 = shalt.err (!%p1736_p1)
}
 0x314   : > { %1575 = dma.vmem_to_hbm [thread:$0]  (%p1889_p5), %s2578_s17, 16, %s2576_s26, %s1163_s22  }
 0x315 PF: > { %p1581_p2 = scmp.ge.s32.totalorder %s1794_s21, 2  ;;  %s1187_s12 = sand.u32 1, %s1782_s18  }
 0x316   : > { %s1188_s15 = scalar_lea.sflag [#allocation3], %s1187_s12 }
 0x317   : > { %p1578_p3 = pnand %p1581_p2, %p1893_p6 }
 0x319   : > { %1777 = dma.done.wait (!%p1578_p3), %s1188_s15, 16  }
 0x31a   : > { %1779 = vsyncadd (!%p1578_p3), %s1188_s15, 4294967280  ;;  %p15_p4 = scmp.ge.s32.totalorder %s1876_s24, 5   ;;  %s2688_s18 = smov %s1786_s19 }
 0x31b   : > { %s2689_s19 = smov %s1790_s20  ;;  %s2690_s20 = smov %s1887_s27 }
 0x31c   : > { %s2691_s21 = smov %s1876_s24  ;;  %17 = sbr.rel (!%p15_p4) target bundleno = 3 (0x3), region = 100 }
 0x323   :  { %1192 = vsyncpa [#allocation3], 1 }
 0x324   :  { %1194 = vsyncpa [#allocation3 + $0x1], 1 }

// kernel: tpu_custom_call.1
= control target key start
LH: loop header
LB: loop body
LE: loop exit
PB: predicated region body
PF: predicated region fallthrough
CT: control target
= control target key end

     0   :  { %10 = vsyncpa [#allocation3], 0  ;;  %s2621_s0 = inlined_call_operand.vmem [shape: s32[3,1,128], index: 0, kind: input, shape index: {}]   ;;  %s2622_s1 = inlined_call_operand.vmem [shape: s32[3,1,128], index: 1, kind: input, shape index: {}]   ;;  %s2623_s2 = inlined_call_operand.vmem [shape: s32[3,1,128], index: 2, kind: input, shape index: {}]   ;;  %s2624_s3 = inlined_call_operand.vmem [shape: f32[600,32], index: 3, kind: input, shape index: {}]   ;;  %s2625_s4 = inlined_call_operand.vmem [shape: f32[40,32], index: 4, kind: input, shape index: {}]   ;;  %s2626_s5 = inlined_call_operand.hbm [shape: f32[3,1,128], index: 5, kind: output, shape index: {}]  }
   0x1   :  { %12 = vsyncpa [#allocation3 + $0x1], 0  ;;  %s1851_s18 = smov 0   ;;  %s1853_s19 = smov 0  }
   0x2   :  { %s1855_s20 = smov 0   ;;  %s1857_s21 = smov 0  }
   0x3 LB: > { %s1872_s22 = sadd.s32 4294967295, %s1794_s21   ;;  %s1264_s23 = sadd.s32 4294967294, %s1794_s21   ;;  %s1794_s21 = sphi %s1857_s21, %s2691_s21   ;;  %s1790_s20 = sphi %s1855_s20, %s2690_s20   ;;  %s1786_s19 = sphi %s1853_s19, %s2689_s19   ;;  %s1782_s18 = sphi %s1851_s18, %s2688_s18  }
   0x4   : > { %s1876_s24 = sadd.s32 1, %s1794_s21   ;;  %s145_s25 = sadd.s32 1, %s1790_s20 }
   0x5   : > { %s142_s26 = ssub.s32 %s1794_s21, %s1876_s24  ;;  %p155_p0 = scmp.ne.s32.totalorder %s1790_s20, %s1786_s19 }
   0x6   : > { %p143_p1 = scmp.eq.s32.totalorder %s142_s26, 0  ;;  %p156_p2 = scmp.eq.s32.totalorder %s1872_s22, 2 }
   0x7   : > { %p161_p3 = scmp.ne.s32.totalorder %s1786_s19, %s1782_s18  ;;  %p162_p4 = scmp.eq.s32.totalorder %s1264_s23, 2 }
   0x8   : > { %s1887_s27 = scalar_select %p143_p1, %s1790_s20, %s145_s25  }
   0x9   : > { %p1889_p5 = por %p156_p2, %p155_p0  ;;  %p1893_p6 = por %p162_p4, %p161_p3 }
   0xa   : > { %p1267_p7 = scmp.ge.s32.totalorder %s1794_s21, 1  ;;  %p204_p8 = scmp.lt.s32.totalorder %s1794_s21, 4 }
   0xc   : > { %p205_p9 = pnand %p1267_p7, %p204_p8 }
   0xe   : > { %208 = sbr.rel (%p205_p9) target bundleno = 789 (0x315), region = 40 }
  0x15   : > { %s233_s30 = sand.u32 1, %s1786_s19   ;;  %p235_p10 = scmp.lt.s32.totalorder %s1872_s22, 2  ;;  %v246_v0 = vlaneseq  ;;  %v2019_v35 = vmov 0.0   ;;  %v2021_v36 = vmov 0.0   ;;  %v2023_v37 = vmov 0.0  }
  0x16   : > { %s2017_s16 = scalar_lea.vmem [#allocation2], %s233_s30  ;;  %v2025_v38 = vmov 0.0   ;;  %s2027_s17 = smov 0  }
  0x17   : > { %s1902_s6 = scalar_select %p235_p10, %s1872_s22, 2  ;;  %v1904_v1 = vshrl.u32 %v246_v0, 7 }
  0x19   : > { %2635 = vst [vmem:[#allocation5_spill] sm:$0xff] %v1904_v1  ;;  %s237_s9 = scalar_lea.vmem %s2621_s0, %s1902_s6  ;;  %s240_s12 = scalar_lea.vmem %s2622_s1, %s1902_s6  ;;  %v1915_v2 = vadd.s32 8, %v1904_v1  ;;  %v1918_v3 = vadd.s32 16, %v1904_v1  ;;  %v1921_v4 = vadd.s32 24, %v1904_v1  ;;  %v1924_v5 = vadd.s32 32, %v1904_v1 }
  0x1a   : > { %s243_s15 = scalar_lea.vmem %s2623_s2, %s1902_s6  ;;  %v1930_v6 = vld [vmem:[%s237_s9] ss:$0 sm:$0xff]  ;;  %v1933_v7 = vadd.s32 40, %v1904_v1  ;;  %v1936_v8 = vadd.s32 48, %v1904_v1  ;;  %v1939_v9 = vadd.s32 56, %v1904_v1  ;;  %v1942_v10 = vadd.s32 64, %v1904_v1 }
  0x1b   : > { %2636 = vst [vmem:[#allocation6_spill] sm:$0xff] %v1915_v2  ;;  %2637 = vst [vmem:[#allocation7_spill] sm:$0xff] %v1918_v3  ;;  %v1944_v11 = vld [vmem:[%s243_s15] ss:$0 sm:$0xff]  ;;  %v1947_v12 = vadd.s32 72, %v1904_v1  ;;  %v1950_v13 = vadd.s32 80, %v1904_v1 }
  0x1c   : > { %v1953_v14 = vadd.s32 88, %v1904_v1  ;;  %v1956_v15 = vadd.s32 96, %v1904_v1  ;;  %v1959_v16 = vadd.s32 104, %v1904_v1  ;;  %v1962_v17 = vadd.s32 112, %v1904_v1 }
  0x1d   : > { %v1965_v18 = vadd.s32 120, %v1904_v1  ;;  %v1968_v19 = vadd.s32 128, %v1904_v1  ;;  %v1971_v20 = vadd.s32 136, %v1904_v1  ;;  %v1974_v21 = vadd.s32 144, %v1904_v1 }
  0x1e   : > { %2638 = vst [vmem:[#allocation8_spill] sm:$0xff] %v1962_v17  ;;  %v1977_v22 = vadd.s32 152, %v1904_v1  ;;  %v1980_v23 = vadd.s32 160, %v1904_v1  ;;  %v1983_v24 = vadd.s32 168, %v1904_v1  ;;  %v1986_v25 = vadd.s32 176, %v1904_v1 }
  0x1f   : > { %2639 = vst [vmem:[#allocation9_spill] sm:$0xff] %v1965_v18  ;;  %2640 = vst [vmem:[#allocation10_spill] sm:$0xff] %v1968_v19  ;;  %v1989_v26 = vadd.s32 184, %v1904_v1  ;;  %v1992_v27 = vadd.s32 192, %v1904_v1  ;;  %v1995_v28 = vadd.s32 200, %v1904_v1  ;;  %v1998_v29 = vadd.s32 208, %v1904_v1 }
  0x20   : > { %2641 = vst [vmem:[#allocation11_spill] sm:$0xff] %v1971_v20  ;;  %2642 = vst [vmem:[#allocation12_spill] sm:$0xff] %v1974_v21  ;;  %v2001_v30 = vadd.s32 216, %v1904_v1  ;;  %v2004_v31 = vadd.s32 224, %v1904_v1  ;;  %v2007_v32 = vadd.s32 232, %v1904_v1  ;;  %v2010_v33 = vadd.s32 240, %v1904_v1 }
  0x21   : > { %2643 = vst [vmem:[#allocation13_spill] sm:$0xff] %v1977_v22  ;;  %v2013_v34 = vadd.s32 248, %v1904_v1 }
  0x23   : > { %2644 = vst [vmem:[#allocation14_spill] sm:$0xff] %v2013_v34 }
  0x24 LB: >> { %2645 = vst [vmem:[#allocation15_spill] sm:$0xff] %v1798_v35  ;;  %2646 = vst [vmem:[#allocation16_spill] sm:$0xff] %v1802_v36  ;;  %s1268_s23 = sshll.u32 %s1814_s17, 8  ;;  %v2651_v1 = vld [vmem:[#allocation5_spill] sm:$0xff]  ;;  %v2652_v2 = vld [vmem:[#allocation6_spill] sm:$0xff]  ;;  %v2631_v61 = vmov 0.0   ;;  %s1814_s17 = sphi %s2027_s17, %s284_s17   ;;  %v1810_v38 = vphi %v2025_v38, %v2680_v38   ;;  %v1806_v37 = vphi %v2023_v37, %v2679_v37   ;;  %v1802_v36 = vphi %v2021_v36, %v2678_v36   ;;  %v1798_v35 = vphi %v2019_v35, %v2677_v35  }
  0x25   : >> { %2647 = vst [vmem:[#allocation17_spill] sm:$0xff] %v1806_v37  ;;  %2648 = vst [vmem:[#allocation18_spill] sm:$0xff] %v1810_v38  ;;  %s2048_s7 = scalar_lea.vmem %s2624_s3, %s1268_s23  ;;  %v2050_v39 = vstv %s1268_s23  ;;  %v2655_v3 = vld [vmem:[#allocation7_spill] sm:$0xff]  ;;  %s284_s17 = sadd.s32 1, %s1814_s17  }
  0x26   : >> { %v291_v40 = vld [vmem:[%s2048_s7] sm:$0xff]  ;;  %v292_v42 = vld [vmem:[%s2048_s7 + $0x8] sm:$0xff]  ;;  %v2061_v47 = vld [vmem:[%s2048_s7 + $0x10] sm:$0xff]  ;;  %v324_v49 = vadd.s32 %v2050_v39, %v2651_v1  ;;  %v325_v50 = vadd.s32 %v2050_v39, %v2652_v2  ;;  %v2091_v56 = vadd.s32 %v2050_v39, %v2655_v3  ;;  %p281_p11 = scmp.ge.s32.totalorder %s284_s17, 2  }
  0x27   : >> { %v307_v41 = vld [vmem:[%s2048_s7 + $0x80] sm:$0xff]  ;;  %v2649_v19 = vld [vmem:[#allocation10_spill] sm:$0xff]  ;;  %v2650_v20 = vld [vmem:[#allocation11_spill] sm:$0xff]  ;;  %s1374_s15 = sshll.u32 (%p281_p11), %s1872_s22, 4  ;;  %s1175_s17 = sshll.u32 (%p281_p11), %s2017_s16, 4  ;;  %s2578_s17 = int_to_ptr.vmem [resolvable:$true] %s1175_s17 }
  0x28   : >> { %v340_v43 = vadd.s32 %v2050_v39, %v2649_v19  ;;  %v341_v44 = vadd.s32 %v2050_v39, %v2650_v20  ;;  %v1658_v45 = vpack.i.bf16 %v291_v40, %v307_v41  ;;  %v308_v46 = vld [vmem:[%s2048_s7 + $0x88] sm:$0xff]  ;;  %v2064_v48 = vld [vmem:[%s2048_s7 + $0x90] sm:$0xff]  ;;  %v2653_v21 = vld [vmem:[#allocation12_spill] sm:$0xff]  ;;  %vm360_vm4 = vcmp.eq.s32.totalorder %v324_v49, %v1930_v6  ;;  %s2576_s26 = scalar_lea.hbm (%p281_p11), %s2626_s5, %s1374_s15  ;;  %s1163_s22 = scalar_lea.sflag (%p281_p11), [#allocation3], %s233_s30 }
  0x29   : >> { %v2072_v51 = vadd.s32 %v2050_v39, %v2653_v21  ;;  %v2075_v52 = vld [vmem:[%s2048_s7 + $0x18] sm:$0xff]  ;;  %v2081_v54 = vld [vmem:[%s2048_s7 + $0x20] sm:$0xff]  ;;  %v1660_v57 = vpack.i.bf16 %v292_v42, %v308_v46  ;;  %v2097_v59 = vld [vmem:[%s2048_s7 + $0x28] sm:$0xff]  ;;  %v1662_v0 = vpack.i.bf16 %v2061_v47, %v2064_v48  ;;  %vm361_vm5 = vcmp.eq.s32.totalorder %v325_v50, %v1930_v6  ;;  %s1820_s8 = smov (%p281_p11), [#allocation2]  }
  0x2a   : >> { %v2078_v53 = vld [vmem:[%s2048_s7 + $0x98] sm:$0xff]  ;;  %vm376_vm0 = vcmp.eq.s32.totalorder %v340_v43, %v1930_v6  ;;  %vm377_vm1 = vcmp.eq.s32.totalorder %v341_v44, %v1930_v6  ;;  %v2654_v22 = vld [vmem:[#allocation13_spill] sm:$0xff]  ;;  %1659 = vxpose.xlu0.b32.start [1/16] (narrow) %v1658_v45, 32  ;;  %vm476_vm2 = vcmp.eq.s32.totalorder %v340_v43, %v1944_v11  ;;  %v2110_v41 = vld [vmem:[%s2048_s7 + $0x30] sm:$0xff]  ;;  %vm477_vm3 = vcmp.eq.s32.totalorder %v341_v44, %v1944_v11  ;;  %s1716_s9 = sshll.u32 (%p281_p11), %s1820_s8, 4  ;;  %s1717_s9 = int_to_ptr.vmem [resolvable:$false] %s1716_s9 }
  0x2b   : >> { %v2087_v55 = vadd.s32 %v2050_v39, %v2654_v22  ;;  %v2094_v58 = vld [vmem:[%s2048_s7 + $0xa0] sm:$0xff]  ;;  %v2100_v60 = vld [vmem:[%s2048_s7 + $0xa8] sm:$0xff]  ;;  %v1285_v62 = vsel %vm376_vm0, 1.0, %v2631_v61  ;;  %v1286_v63 = vsel %vm377_vm1, 1.0, %v2631_v61  ;;  %v2113_v42 = vld [vmem:[%s2048_s7 + $0xb0] sm:$0xff]  ;;  %v1317_v46 = vsel %vm476_vm2, 1.0, %v2631_v61  ;;  %p1719_p1 = scmp.lt.s32.totalorder (%p281_p11), %s2578_s17, %s1717_s9 }
  0x2c   : >> { %v2116_v45 = vld [vmem:[%s2048_s7 + $0x38] sm:$0xff]  ;;  %v2126_v48 = vld [vmem:[%s2048_s7 + $0x40] sm:$0xff]  ;;  %v1318_v19 = vsel %vm477_vm3, 1.0, %v2631_v61  ;;  %v572_v20 = vsub.f32 %v1285_v62, %v1317_v46  ;;  %v2138_v21 = vld [vmem:[%s2048_s7 + $0x48] sm:$0xff]  ;;  %v1269_v1 = vsel %vm360_vm4, 1.0, %v2631_v61  ;;  %v1270_v35 = vsel %vm361_vm5, 1.0, %v2631_v61 }
  0x2d   : >> { %v2123_v47 = vld [vmem:[%s2048_s7 + $0xb8] sm:$0xff]  ;;  %v2129_v40 = vld [vmem:[%s2048_s7 + $0xc0] sm:$0xff]  ;;  %v2141_v22 = vld [vmem:[%s2048_s7 + $0xc8] sm:$0xff]  ;;  %v573_v2 = vsub.f32 %v1286_v63, %v1318_v19  ;;  %vm460_vm6 = vcmp.eq.s32.totalorder %v324_v49, %v1944_v11  ;;  %vm461_vm7 = vcmp.eq.s32.totalorder %v325_v50, %v1944_v11  ;;  %v2656_v49 = vmov 0.0   ;;  %s1718_s10 = scalar_lea.vmem (%p281_p11), %s1717_s9, 32 }
  0x2e   : >> { %v2144_v3 = vld [vmem:[%s2048_s7 + $0x50] sm:$0xff]  ;;  %1661 = vxpose.xlu0.b32.cont [2/16] (narrow) %v1660_v57, 32  ;;  %v2153_v43 = vld [vmem:[%s2048_s7 + $0x58] sm:$0xff]  ;;  %v2166_v63 = vld [vmem:[%s2048_s7 + $0x60] sm:$0xff]  ;;  %v1301_v18 = vsel %vm460_vm6, 1.0, %v2656_v49  ;;  %v1302_v19 = vsel %vm461_vm7, 1.0, %v2656_v49  ;;  %vm378_vm8 = vcmp.eq.s32.totalorder %v2072_v51, %v1930_v6  ;;  %vm379_vm9 = vcmp.eq.s32.totalorder %v2087_v55, %v1930_v6 }
  0x2f   : >> { %v2150_v46 = vld [vmem:[%s2048_s7 + $0xd0] sm:$0xff]  ;;  %v2156_v44 = vld [vmem:[%s2048_s7 + $0xd8] sm:$0xff]  ;;  %v2169_v62 = vld [vmem:[%s2048_s7 + $0xe0] sm:$0xff]  ;;  %v1491_v37 = vpack.c.bf16 %v573_v2, %v572_v20  ;;  %v556_v20 = vsub.f32 %v1269_v1, %v1301_v18  ;;  %v557_v50 = vsub.f32 %v1270_v35, %v1302_v19  ;;  %v1287_v17 = vsel %vm378_vm8, 1.0, %v2656_v49 }
  0x30   : >> { %v2172_v36 = vld [vmem:[%s2048_s7 + $0x68] sm:$0xff]  ;;  %v1682_v2 = vpack.i.bf16 %v2166_v63, %v2169_v62  ;;  %vm478_vm10 = vcmp.eq.s32.totalorder %v2072_v51, %v1944_v11  ;;  %v1288_v34 = vsel %vm379_vm9, 1.0, %v2656_v49  ;;  %vm479_vm11 = vcmp.eq.s32.totalorder %v2087_v55, %v1944_v11 }
  0x31   : >> { %v2178_v38 = vld [vmem:[%s2048_s7 + $0xe8] sm:$0xff]  ;;  %1492 = vmatprep.subr.bf16.mxu0 %v1491_v37  ;;  %1551 = vmatprep.subr.bf16.mxu1 %v1491_v37  ;;  %v1493_v57 = vpack.c.bf16 %v557_v50, %v556_v20  ;;  %v1319_v1 = vsel %vm478_vm10, 1.0, %v2656_v49  ;;  %v1320_v18 = vsel %vm479_vm11, 1.0, %v2656_v49  ;;  %vm362_vm12 = vcmp.eq.s32.totalorder %v2091_v56, %v1930_v6 }
  0x32   : >> { %1663 = vxpose.xlu0.b32.cont [3/16] (narrow) %v1662_v0, 32  ;;  %v1684_v61 = vpack.i.bf16 %v2172_v36, %v2178_v38  ;;  %v574_v35 = vsub.f32 %v1287_v17, %v1319_v1  ;;  %v327_v0 = vadd.s32 %v2050_v39, %v1921_v4  ;;  %v575_v51 = vsub.f32 %v1288_v34, %v1320_v18 }
  0x33   : >> { %1494 = vmatpush3.bf16.msra.mxu0 %v1493_v57  ;;  %v1271_v37 = vsel %vm362_vm12, 1.0, %v2656_v49  ;;  %vm462_vm13 = vcmp.eq.s32.totalorder %v2091_v56, %v1944_v11  ;;  %v344_v55 = vadd.s32 %v2050_v39, %v1980_v23  ;;  %1559 = vmatpush3.bf16.msra.mxu1 %v1493_v57  ;;  %v2657_v17 = vpack.i.bf16 %v2075_v52, %v2078_v53 }
  0x34   : >> { %vm363_vm14 = vcmp.eq.s32.totalorder %v327_v0, %v1930_v6  ;;  %vm463_vm15 = vcmp.eq.s32.totalorder %v327_v0, %v1944_v11  ;;  %v1303_v19 = vsel %vm462_vm13, 1.0, %v2656_v49  ;;  %v345_v34 = vadd.s32 %v2050_v39, %v1983_v24 }
  0x35   : >> { %v1495_v20 = vpack.c.bf16 %v575_v51, %v574_v35  ;;  %v1272_v56 = vsel %vm363_vm14, 1.0, %v2656_v49  ;;  %v1304_v50 = vsel %vm463_vm15, 1.0, %v2656_v49  ;;  %v558_v1 = vsub.f32 %v1271_v37, %v1303_v19 }
  0x36   : >> { %1665 = vxpose.xlu0.b32.cont [4/16] (narrow) %v2657_v17, 32  ;;  %v559_v57 = vsub.f32 %v1272_v56, %v1304_v50  ;;  %vm380_vm0 = vcmp.eq.s32.totalorder %v344_v55, %v1930_v6  ;;  %vm381_vm1 = vcmp.eq.s32.totalorder %v345_v34, %v1930_v6  ;;  %vm480_vm2 = vcmp.eq.s32.totalorder %v344_v55, %v1944_v11 }
  0x37   : >> { %1496 = vmatprep.subr.bf16.mxu0 %v1495_v20  ;;  %v1289_v52 = vsel %vm380_vm0, 1.0, %v2656_v49  ;;  %v1290_v53 = vsel %vm381_vm1, 1.0, %v2656_v49  ;;  %vm481_vm3 = vcmp.eq.s32.totalorder %v345_v34, %v1944_v11  ;;  %v1321_v18 = vsel %vm480_vm2, 1.0, %v2656_v49  ;;  %1552 = vmatprep.subr.bf16.mxu1 %v1495_v20 }
  0x38   : >> { %v2658_v35 = vpack.i.bf16 %v2081_v54, %v2094_v58  ;;  %v1497_v0 = vpack.c.bf16 %v559_v57, %v558_v1  ;;  %v1322_v51 = vsel %vm481_vm3, 1.0, %v2656_v49  ;;  %v576_v37 = vsub.f32 %v1289_v52, %v1321_v18 }
  0x39   : >> { %v328_v55 = vadd.s32 %v2050_v39, %v1924_v5  ;;  %v577_v17 = vsub.f32 %v1290_v53, %v1322_v51  ;;  %v329_v19 = vadd.s32 %v2050_v39, %v1933_v7  ;;  %v346_v34 = vadd.s32 %v2050_v39, %v1986_v25 }
  0x3a   : >> { %1667 = vxpose.xlu0.b32.cont [5/16] (narrow) %v2658_v35, 32  ;;  %v347_v20 = vadd.s32 %v2050_v39, %v1989_v26  ;;  %1498 = vmatpush3.bf16.msra.mxu0 %v1497_v0  ;;  %v330_v54 = vadd.s32 %v2050_v39, %v1936_v8  ;;  %v2659_v50 = vpack.i.bf16 %v2097_v59, %v2100_v60 }
  0x3b   : >> { %vm364_vm4 = vcmp.eq.s32.totalorder %v328_v55, %v1930_v6  ;;  %vm464_vm5 = vcmp.eq.s32.totalorder %v328_v55, %v1944_v11  ;;  %1560 = vmatpush3.bf16.msra.mxu1 %v1497_v0  ;;  %v1499_v58 = vpack.c.bf16 %v577_v17, %v576_v37  ;;  %vm365_vm6 = vcmp.eq.s32.totalorder %v329_v19, %v1930_v6 }
  0x3c   : >> { %v1273_v56 = vsel %vm364_vm4, 1.0, %v2656_v49  ;;  %vm465_vm7 = vcmp.eq.s32.totalorder %v329_v19, %v1944_v11  ;;  %v1274_v1 = vsel %vm365_vm6, 1.0, %v2656_v49  ;;  %v1305_v57 = vsel %vm464_vm5, 1.0, %v2656_v49 }
  0x3d   : >> { %v1306_v52 = vsel %vm465_vm7, 1.0, %v2656_v49  ;;  %vm382_vm8 = vcmp.eq.s32.totalorder %v346_v34, %v1930_v6  ;;  %1500 = vmatprep.subr.bf16.mxu0 %v1499_v58  ;;  %v560_v53 = vsub.f32 %v1273_v56, %v1305_v57  ;;  %vm383_vm9 = vcmp.eq.s32.totalorder %v347_v20, %v1930_v6  ;;  %1553 = vmatprep.subr.bf16.mxu1 %v1499_v58 }
  0x3e   : >> { %1669 = vxpose.xlu0.b32.cont [6/16] (narrow) %v2659_v50, 32  ;;  %v561_v18 = vsub.f32 %v1274_v1, %v1306_v52  ;;  %v1291_v35 = vsel %vm382_vm8, 1.0, %v2656_v49  ;;  %v1292_v0 = vsel %vm383_vm9, 1.0, %v2656_v49  ;;  %vm482_vm10 = vcmp.eq.s32.totalorder %v346_v34, %v1944_v11 }
  0x3f   : >> { %vm483_vm11 = vcmp.eq.s32.totalorder %v347_v20, %v1944_v11  ;;  %v331_v59 = vadd.s32 %v2050_v39, %v1939_v9  ;;  %v1323_v51 = vsel %vm482_vm10, 1.0, %v2656_v49  ;;  %vm366_vm12 = vcmp.eq.s32.totalorder %v330_v54, %v1930_v6 }
  0x40   : >> { %v1501_v60 = vpack.c.bf16 %v561_v18, %v560_v53  ;;  %v1324_v37 = vsel %vm483_vm11, 1.0, %v2656_v49  ;;  %v2660_v55 = vpack.i.bf16 %v2110_v41, %v2113_v42  ;;  %v578_v17 = vsub.f32 %v1291_v35, %v1323_v51 }
  0x41   : >> { %v579_v19 = vsub.f32 %v1292_v0, %v1324_v37  ;;  %vm367_vm13 = vcmp.eq.s32.totalorder %v331_v59, %v1930_v6  ;;  %v1275_v34 = vsel %vm366_vm12, 1.0, %v2656_v49  ;;  %vm466_vm14 = vcmp.eq.s32.totalorder %v330_v54, %v1944_v11 }
  0x42   : >> { %1671 = vxpose.xlu0.b32.cont [7/16] (narrow) %v2660_v55, 32  ;;  %1502 = vmatpush3.bf16.msra.mxu0 %v1501_v60  ;;  %v1276_v20 = vsel %vm367_vm13, 1.0, %v2656_v49  ;;  %vm467_vm15 = vcmp.eq.s32.totalorder %v331_v59, %v1944_v11  ;;  %v348_v58 = vadd.s32 %v2050_v39, %v1992_v27  ;;  %v1307_v41 = vsel %vm466_vm14, 1.0, %v2656_v49 }
  0x43   : >> { %1561 = vmatpush3.bf16.msra.mxu1 %v1501_v60  ;;  %v1503_v56 = vpack.c.bf16 %v579_v19, %v578_v17  ;;  %v1308_v42 = vsel %vm467_vm15, 1.0, %v2656_v49  ;;  %v349_v50 = vadd.s32 %v2050_v39, %v1995_v28  ;;  %v562_v1 = vsub.f32 %v1275_v34, %v1307_v41 }
  0x44   : >> { %v563_v57 = vsub.f32 %v1276_v20, %v1308_v42  ;;  %vm384_vm0 = vcmp.eq.s32.totalorder %v348_v58, %v1930_v6  ;;  %vm484_vm1 = vcmp.eq.s32.totalorder %v348_v58, %v1944_v11  ;;  %v2661_v54 = vpack.i.bf16 %v2116_v45, %v2123_v47 }
  0x45   : >> { %1504 = vmatprep.subr.bf16.mxu0 %v1503_v56  ;;  %vm385_vm2 = vcmp.eq.s32.totalorder %v349_v50, %v1930_v6  ;;  %v1293_v52 = vsel %vm384_vm0, 1.0, %v2656_v49  ;;  %vm485_vm3 = vcmp.eq.s32.totalorder %v349_v50, %v1944_v11  ;;  %v1325_v53 = vsel %vm484_vm1, 1.0, %v2656_v49  ;;  %1554 = vmatprep.subr.bf16.mxu1 %v1503_v56 }
  0x46   : >> { %1673 = vxpose.xlu0.b32.cont [8/16] (narrow) %v2661_v54, 32  ;;  %v1505_v18 = vpack.c.bf16 %v563_v57, %v562_v1  ;;  %v1294_v35 = vsel %vm385_vm2, 1.0, %v2656_v49  ;;  %v1326_v0 = vsel %vm485_vm3, 1.0, %v2656_v49  ;;  %v580_v59 = vsub.f32 %v1293_v52, %v1325_v53 }
  0x47   : >> { %v581_v60 = vsub.f32 %v1294_v35, %v1326_v0  ;;  %v332_v45 = vadd.s32 %v2050_v39, %v1942_v10  ;;  %v333_v47 = vadd.s32 %v2050_v39, %v1947_v12  ;;  %v350_v51 = vadd.s32 %v2050_v39, %v1998_v29 }
  0x48   : >> { %1506 = vmatpush3.bf16.msra.mxu0 %v1505_v18  ;;  %v351_v37 = vadd.s32 %v2050_v39, %v2001_v30  ;;  %1562 = vmatpush3.bf16.msra.mxu1 %v1505_v18  ;;  %v334_v55 = vadd.s32 %v2050_v39, %v1950_v13  ;;  %v335_v17 = vadd.s32 %v2050_v39, %v1953_v14  ;;  %v1003_v14 = vld [vmem:[%s2625_s4 + $0x8] sm:$0xff] (%p281_p11)  ;;  %v755_v27 = vadd.s32 (%p281_p11), 512, %v1921_v4 }
  0x49   : >> { %v2662_v19 = vpack.i.bf16 %v2126_v48, %v2129_v40  ;;  %v1507_v34 = vpack.c.bf16 %v581_v60, %v580_v59  ;;  %vm368_vm4 = vcmp.eq.s32.totalorder %v332_v45, %v1930_v6  ;;  %vm369_vm5 = vcmp.eq.s32.totalorder %v333_v47, %v1930_v6 }
  0x4a   : >> { %vm468_vm6 = vcmp.eq.s32.totalorder %v332_v45, %v1944_v11  ;;  %v1277_v20 = vsel %vm368_vm4, 1.0, %v2656_v49  ;;  %v1278_v58 = vsel %vm369_vm5, 1.0, %v2656_v49  ;;  %vm469_vm7 = vcmp.eq.s32.totalorder %v333_v47, %v1944_v11 }
  0x4b   : >> { %1675 = vxpose.xlu0.b32.cont [9/16] (narrow) %v2662_v19, 32  ;;  %v1309_v56 = vsel %vm468_vm6, 1.0, %v2656_v49  ;;  %1508 = vmatprep.subr.bf16.mxu0 %v1507_v34  ;;  %v1310_v41 = vsel %vm469_vm7, 1.0, %v2656_v49  ;;  %vm386_vm8 = vcmp.eq.s32.totalorder %v350_v51, %v1930_v6  ;;  %vm387_vm9 = vcmp.eq.s32.totalorder %v351_v37, %v1930_v6 }
  0x4c   : >> { %v564_v40 = vsub.f32 %v1277_v20, %v1309_v56  ;;  %1555 = vmatprep.subr.bf16.mxu1 %v1507_v34  ;;  %v565_v48 = vsub.f32 %v1278_v58, %v1310_v41  ;;  %v1295_v42 = vsel %vm386_vm8, 1.0, %v2656_v49  ;;  %v1296_v50 = vsel %vm387_vm9, 1.0, %v2656_v49 }
  0x4d   : >> { %vm486_vm10 = vcmp.eq.s32.totalorder %v350_v51, %v1944_v11  ;;  %v2663_v1 = vpack.i.bf16 %v2138_v21, %v2141_v22  ;;  %vm487_vm11 = vcmp.eq.s32.totalorder %v351_v37, %v1944_v11  ;;  %vm370_vm12 = vcmp.eq.s32.totalorder %v334_v55, %v1930_v6 }
  0x4e   : >> { %v1327_v57 = vsel %vm486_vm10, 1.0, %v2656_v49  ;;  %vm371_vm13 = vcmp.eq.s32.totalorder %v335_v17, %v1930_v6  ;;  %v1509_v54 = vpack.c.bf16 %v565_v48, %v564_v40  ;;  %v1328_v52 = vsel %vm487_vm11, 1.0, %v2656_v49 }
  0x4f   : >> { %1677 = vxpose.xlu0.b32.cont [10/16] (narrow) %v2663_v1, 32  ;;  %v582_v53 = vsub.f32 %v1295_v42, %v1327_v57  ;;  %v1279_v18 = vsel %vm370_vm12, 1.0, %v2656_v49  ;;  %v583_v35 = vsub.f32 %v1296_v50, %v1328_v52  ;;  %v1280_v0 = vsel %vm371_vm13, 1.0, %v2656_v49  ;;  %v2666_v50 = vld [vmem:[#allocation14_spill] sm:$0xff] }
  0x50   : >> { %vm470_vm14 = vcmp.eq.s32.totalorder %v334_v55, %v1944_v11  ;;  %vm471_vm15 = vcmp.eq.s32.totalorder %v335_v17, %v1944_v11  ;;  %1510 = vmatpush3.bf16.msra.mxu0 %v1509_v54  ;;  %v352_v59 = vadd.s32 %v2050_v39, %v2004_v31  ;;  %v353_v60 = vadd.s32 %v2050_v39, %v2007_v32  ;;  %v743_v32 = vld [vmem:[%s2624_s3 + $0x210] sm:$0xff] (%p281_p11) }
  0x51   : >> { %v1311_v21 = vsel %vm470_vm14, 1.0, %v2656_v49  ;;  %v1312_v22 = vsel %vm471_vm15, 1.0, %v2656_v49  ;;  %1563 = vmatpush3.bf16.msra.mxu1 %v1509_v54  ;;  %v2664_v45 = vpack.i.bf16 %v2144_v3, %v2150_v46  ;;  %v1511_v47 = vpack.c.bf16 %v583_v35, %v582_v53  ;;  %v305_v53 = vld [vmem:[%s2048_s7 + $0x70] sm:$0xff] }
  0x52   : >> { %v566_v51 = vsub.f32 %v1279_v18, %v1311_v21  ;;  %v567_v37 = vsub.f32 %v1280_v0, %v1312_v22  ;;  %v336_v55 = vadd.s32 %v2050_v39, %v1956_v15  ;;  %vm388_vm0 = vcmp.eq.s32.totalorder %v352_v59, %v1930_v6  ;;  %v321_v18 = vld [vmem:[%s2048_s7 + $0xf0] sm:$0xff] }
  0x53   : >> { %1679 = vxpose.xlu0.b32.cont [11/16] (narrow) %v2664_v45, 32  ;;  %vm389_vm1 = vcmp.eq.s32.totalorder %v353_v60, %v1930_v6  ;;  %vm488_vm2 = vcmp.eq.s32.totalorder %v352_v59, %v1944_v11  ;;  %vm489_vm3 = vcmp.eq.s32.totalorder %v353_v60, %v1944_v11  ;;  %1512 = vmatprep.subr.bf16.mxu0 %v1511_v47  ;;  %v1297_v19 = vsel %vm388_vm0, 1.0, %v2656_v49  ;;  %v2667_v45 = vld [vmem:[#allocation8_spill] sm:$0xff] }
  0x54   : >> { %v1513_v17 = vpack.c.bf16 %v567_v37, %v566_v51  ;;  %v1298_v3 = vsel %vm389_vm1, 1.0, %v2656_v49  ;;  %v1329_v46 = vsel %vm488_vm2, 1.0, %v2656_v49  ;;  %1556 = vmatprep.subr.bf16.mxu1 %v1511_v47  ;;  %v1330_v34 = vsel %vm489_vm3, 1.0, %v2656_v49 }
  0x55   : >> { %v584_v20 = vsub.f32 %v1297_v19, %v1329_v46  ;;  %v337_v58 = vadd.s32 %v2050_v39, %v1959_v16  ;;  %vm372_vm4 = vcmp.eq.s32.totalorder %v336_v55, %v1930_v6  ;;  %v2665_v56 = vpack.i.bf16 %v2153_v43, %v2156_v44 }
  0x56   : >> { %1514 = vmatpush3.bf16.msra.mxu0 %v1513_v17  ;;  %v585_v41 = vsub.f32 %v1298_v3, %v1330_v34  ;;  %v1281_v40 = vsel %vm372_vm4, 1.0, %v2656_v49  ;;  %vm472_vm5 = vcmp.eq.s32.totalorder %v336_v55, %v1944_v11  ;;  %v354_v48 = vadd.s32 %v2050_v39, %v2010_v33  ;;  %1564 = vmatpush3.bf16.msra.mxu1 %v1513_v17  ;;  %v306_v17 = vld [vmem:[%s2048_s7 + $0x78] sm:$0xff]  ;;  %v1004_v33 = vld [vmem:[%s2625_s4 + $0x10] sm:$0xff] (%p281_p11) }
  0x57   : >> { %1681 = vxpose.xlu0.b32.cont [12/16] (narrow) %v2665_v56, 32  ;;  %vm373_vm6 = vcmp.eq.s32.totalorder %v337_v58, %v1930_v6  ;;  %vm473_vm7 = vcmp.eq.s32.totalorder %v337_v58, %v1944_v11  ;;  %v1313_v42 = vsel %vm472_vm5, 1.0, %v2656_v49  ;;  %v355_v43 = vadd.s32 %v2050_v39, %v2666_v50 }
  0x58   : >> { %v1515_v44 = vpack.c.bf16 %v585_v41, %v584_v20  ;;  %v1282_v1 = vsel %vm373_vm6, 1.0, %v2656_v49  ;;  %v1314_v57 = vsel %vm473_vm7, 1.0, %v2656_v49  ;;  %v568_v54 = vsub.f32 %v1281_v40, %v1313_v42 }
  0x59   : >> { %v569_v52 = vsub.f32 %v1282_v1, %v1314_v57  ;;  %vm390_vm8 = vcmp.eq.s32.totalorder %v354_v48, %v1930_v6  ;;  %vm391_vm9 = vcmp.eq.s32.totalorder %v355_v43, %v1930_v6  ;;  %vm490_vm10 = vcmp.eq.s32.totalorder %v354_v48, %v1944_v11 }
  0x5a   : >> { %1516 = vmatprep.subr.bf16.mxu0 %v1515_v44  ;;  %v1299_v35 = vsel %vm390_vm8, 1.0, %v2656_v49  ;;  %v1300_v0 = vsel %vm391_vm9, 1.0, %v2656_v49  ;;  %vm491_vm11 = vcmp.eq.s32.totalorder %v355_v43, %v1944_v11  ;;  %v1331_v21 = vsel %vm490_vm10, 1.0, %v2656_v49  ;;  %1557 = vmatprep.subr.bf16.mxu1 %v1515_v44 }
  0x5b   : >> { %1683 = vxpose.xlu0.b32.cont [13/16] (narrow) %v1682_v2, 32  ;;  %v1517_v22 = vpack.c.bf16 %v569_v52, %v568_v54  ;;  %v1332_v59 = vsel %vm491_vm11, 1.0, %v2656_v49  ;;  %v586_v60 = vsub.f32 %v1299_v35, %v1331_v21  ;;  %v338_v62 = vadd.s32 %v2050_v39, %v2667_v45  ;;  %v2668_v2 = vld [vmem:[#allocation9_spill] sm:$0xff] }
  0x5c   : >> { %v587_v63 = vsub.f32 %v1300_v0, %v1332_v59  ;;  %v339_v47 = vadd.s32 %v2050_v39, %v2668_v2  ;;  %v1686_v51 = vpack.i.bf16 %v305_v53, %v321_v18  ;;  %v322_v39 = vld [vmem:[%s2048_s7 + $0xf8] sm:$0xff]  ;;  %v2669_v53 = vld [vmem:[#allocation18_spill] sm:$0xff]  ;;  %v1817_v15 = vmov (%p281_p11), 0.0   ;;  %s1712_s7 = scalar_lea.vmem (%p281_p11), %s2578_s17, 16 }
  0x5d   : >> { %1518 = vmatpush3.bf16.msra.mxu0 %v1517_v22  ;;  %vm374_vm12 = vcmp.eq.s32.totalorder %v338_v62, %v1930_v6  ;;  %vm474_vm13 = vcmp.eq.s32.totalorder %v338_v62, %v1944_v11  ;;  %1565 = vmatpush3.bf16.msra.mxu1 %v1517_v22  ;;  %v1688_v36 = vpack.i.bf16 %v306_v17, %v322_v39  ;;  %v2671_v22 = vld [vmem:[#allocation17_spill] sm:$0xff]  ;;  %v2675_v17 = vld [vmem:[#allocation15_spill] sm:$0xff]  ;;  %v756_v30 = vadd.s32 (%p281_p11), 512, %v1924_v5  ;;  %p1713_p12 = scmp.ne.s32.totalorder (%p281_p11), %s2578_s17, %s1712_s7  ;;  %p1720_p2 = scmp.lt.s32.totalorder (%p281_p11), %s1718_s10, %s1712_s7 }
  0x5e   : >> { %v1519_v37 = vpack.c.bf16 %v587_v63, %v586_v60  ;;  %vm375_vm14 = vcmp.eq.s32.totalorder %v339_v47, %v1930_v6  ;;  %v1283_v55 = vsel %vm374_vm12, 1.0, %v2656_v49  ;;  %vm475_vm15 = vcmp.eq.s32.totalorder %v339_v47, %v1944_v11  ;;  %v2673_v63 = vld [vmem:[#allocation16_spill] sm:$0xff] }
  0x5f   : >> { %1685 = vxpose.xlu0.b32.cont [14/16] (narrow) %v1684_v61, 32  ;;  %v1284_v19 = vsel %vm375_vm14, 1.0, %v2656_v49  ;;  %v1315_v3 = vsel %vm474_vm13, 1.0, %v2656_v49  ;;  %v1316_v46 = vsel %vm475_vm15, 1.0, %v2656_v49  ;;  %v757_v31 = vadd.s32 (%p281_p11), 512, %v1933_v7  ;;  %p1714_p13 = pnand (%p281_p11), %p1713_p12, %p1889_p5  ;;  %p1721_p3 = por (%p281_p11), %p1720_p2, %p1719_p1 }
  0x60   : >> { %1520 = vmatprep.subr.bf16.mxu0 %v1519_v37  ;;  %v570_v34 = vsub.f32 %v1283_v55, %v1315_v3  ;;  %v571_v20 = vsub.f32 %v1284_v19, %v1316_v46  ;;  %1558 = vmatprep.subr.bf16.mxu1 %v1519_v37  ;;  %v741_v19 = vld [vmem:[%s2624_s3 + $0x200] sm:$0xff] (%p281_p11)  ;;  %vm770_vm6 = vcmp.eq.s32.totalorder (%p281_p11), %v755_v27, %v1930_v6 }
  0x61   : > { %v1002_v3 = vld [vmem:[%s2625_s4] sm:$0xff] (%p281_p11)  ;;  %vm807_vm7 = vcmp.eq.s32.totalorder (%p281_p11), %v755_v27, %v1944_v11  ;;  %vm771_vm8 = vcmp.eq.s32.totalorder (%p281_p11), %v756_v30, %v1930_v6  ;;  %vm772_vm9 = vcmp.eq.s32.totalorder (%p281_p11), %v757_v31, %v1930_v6  ;;  %vm808_vm10 = vcmp.eq.s32.totalorder (%p281_p11), %v756_v30, %v1944_v11  ;;  %p1715_p0 = pneg (%p281_p11), %p1714_p13 }
  0x62   : >> { %v1521_v38 = vpack.c.bf16 %v571_v20, %v570_v34  ;;  %v2681_v46 = vld [vmem:[#allocation5_spill] sm:$0xff] (%p281_p11)  ;;  %v2682_v20 = vld [vmem:[#allocation6_spill] sm:$0xff] (%p281_p11)  ;;  %1007 = vxpose.xlu1.b32.start [1/5] (short) (narrow) (%p281_p11), %v1002_v3, 32  ;;  %v1347_v7 = vsel (%p281_p11), %vm807_vm7, 1.0, %v1817_v15  ;;  %vm809_vm11 = vcmp.eq.s32.totalorder (%p281_p11), %v757_v31, %v1944_v11  ;;  %v1818_v3 = vmov (%p281_p11), 1.0|1.0  }
  0x63   : >> { %1687 = vxpose.xlu0.b32.cont [15/16] (narrow) %v1686_v51, 32  ;;  %v752_v34 = vadd.s32 (%p281_p11), 512, %v2681_v46  ;;  %p1722_p4 = pnand (%p281_p11), %p1721_p3, %p1715_p0 }
  0x64   : >> { %1522 = vmatpush3.bf16.msra.mxu0 %v1521_v38  ;;  %1566 = vmatpush3.bf16.msra.mxu1 %v1521_v38 }
  0x65   : > { %vm767_vm0 = vcmp.eq.s32.totalorder (%p281_p11), %v752_v34, %v1930_v6  ;;  %vm804_vm2 = vcmp.eq.s32.totalorder (%p281_p11), %v752_v34, %v1944_v11  ;;  %v746_v34 = vld [vmem:[%s2624_s3 + $0x228] sm:$0xff] (%p281_p11) }
  0x66   : > { %v1333_v16 = vsel (%p281_p11), %vm767_vm0, 1.0, %v1817_v15  ;;  %v1344_v24 = vsel (%p281_p11), %vm804_vm2, 1.0, %v1817_v15  ;;  %1008 = vxpose.xlu1.b32.cont [2/5] (short) (narrow) (%p281_p11), %v1003_v14, 32 }
  0x67   : >> { %1689 = vxpose.xlu0.b32.end [16/16] (narrow) %v1688_v36, 32  ;;  %v837_v26 = vsub.f32 (%p281_p11), %v1333_v16, %v1344_v24  ;;  %v1819_v16 = vmov (%p281_p11), 1.0   ;;  %v751_v24 = vld [vmem:[%s2624_s3 + $0x250] sm:$0xff] (%p281_p11) }
  0x6a   : > { %1009 = vxpose.xlu1.b32.cont [3/5] (short) (narrow) (%p281_p11), %v1004_v33, 32 }
  0x6b   : > { %848 = vxpose.xlu0.b32.start [1/11] (short) (narrow) (%p281_p11), %v741_v19, 32 }
  0xab   : >> { %v1690_v61 = vpop.trf.xlu0 }
  0xac   : >> { %v1691_v58 = vunpack.i.l.bf16 %v1690_v61  ;;  %v1694_v56 = vunpack.i.h.bf16 %v1690_v61  ;;  %v2683_v61 = vld [vmem:[#allocation7_spill] sm:$0xff] (%p281_p11) }
  0xae   : >> { %716 = vmatprep.mubr.f32.mxu0 %v1691_v58  ;;  %v754_v58 = vadd.s32 (%p281_p11), 512, %v2683_v61 }
  0xaf   : >> { %v1695_v41 = vpop.trf.xlu0  ;;  %717 = vmatmul.mubr.f32.vlgmr.msra.gmra.mrb[0].mxu0 %v1694_v56  ;;  %v742_v56 = vld [vmem:[%s2624_s3 + $0x208] sm:$0xff] (%p281_p11) }
  0xb0   : >> { %v1696_v40 = vunpack.i.l.bf16 %v1695_v41  ;;  %v1699_v48 = vunpack.i.h.bf16 %v1695_v41  ;;  %vm769_vm4 = vcmp.eq.s32.totalorder (%p281_p11), %v754_v58, %v1930_v6  ;;  %849 = vxpose.xlu0.b32.cont [2/11] (short) (narrow) (%p281_p11), %v742_v56, 32  ;;  %vm806_vm5 = vcmp.eq.s32.totalorder (%p281_p11), %v754_v58, %v1944_v11 }
  0xb1   : > { %v1335_v28 = vsel (%p281_p11), %vm769_vm4, 1.0, %v1817_v15 }
  0xb2   : >> { %721 = vmatprep.mubr.f32.mxu0 %v1696_v40  ;;  %v1336_v40 = vsel (%p281_p11), %vm770_vm6, 1.0, %v1817_v15 }
  0xb3   : >> { %v1700_v49 = vpop.trf.xlu0  ;;  %722 = vmatmul.mubr.f32.gmra.mrb[2].mxu0 %v1699_v48 }
  0xb4   : >> { %v1701_v42 = vunpack.i.l.bf16 %v1700_v49  ;;  %v1704_v50 = vunpack.i.h.bf16 %v1700_v49  ;;  %v840_v49 = vsub.f32 (%p281_p11), %v1336_v40, %v1347_v7  ;;  %850 = vxpose.xlu0.b32.cont [3/11] (short) (narrow) (%p281_p11), %v743_v32, 32 }
  0xb6   : >> { %726 = vmatprep.mubr.f32.mxu1 %v1701_v42  ;;  %v2469_v42 = vld [vmem:[%s240_s12] ss:$0 sm:$0xff] (%p281_p11) }
  0xb7   : >> { %v1705_v43 = vpop.trf.xlu0  ;;  %727 = vmatmul.mubr.f32.vlgmr.msra.gmra.mrb[0].mxu1 %v1704_v50  ;;  %v1338_v50 = vsel (%p281_p11), %vm772_vm9, 1.0, %v1817_v15  ;;  %vm987_vm14 = vcmp.eq.s32.totalorder (%p281_p11), %v2681_v46, %v2469_v42  ;;  %vm990_vm4 = vcmp.eq.s32.totalorder (%p281_p11), %v1921_v4, %v2469_v42 }
  0xb8   : >> { %v1709_v44 = vunpack.i.h.bf16 %v1705_v43  ;;  %v1706_v1 = vunpack.i.l.bf16 %v1705_v43  ;;  %v1348_v43 = vsel (%p281_p11), %vm808_vm10, 1.0, %v1817_v15 }
  0xba   : >> { %731 = vmatprep.mubr.f32.mxu1 %v1706_v1  ;;  %v1005_v1 = vld [vmem:[%s2625_s4 + $0x18] sm:$0xff] (%p281_p11) }
  0xbb   : >> { %732 = vmatmul.mubr.f32.gmra.mrb[2].mxu1 %v1709_v44  ;;  %v744_v44 = vld [vmem:[%s2624_s3 + $0x218] sm:$0xff] (%p281_p11)  ;;  %1010 = vxpose.xlu1.b32.cont [4/5] (short) (narrow) (%p281_p11), %v1005_v1, 32 }
  0xbc   : > { %851 = vxpose.xlu0.b32.cont [4/11] (short) (narrow) (%p281_p11), %v744_v44, 32 }
 0x182   : >> { %v1411_v57 = vpop.f32.mrb[0].mxu0 }
 0x183   : >> { %v1412_v54 = vpop.f32.mrb[1].mxu0 }
 0x184   : >> { %v1413_v52 = vadd.f32 %v1412_v54, %v1411_v57  ;;  %v1349_v54 = vsel (%p281_p11), %vm809_vm11, 1.0, %v1817_v15 }
 0x186   : >> { %v2394_v38 = vadd.f32 %v2669_v53, %v1413_v52   ;;  %v1414_v35 = vpop.f32.mrb[2].mxu0  ;;  %v759_v53 = vadd.s32 (%p281_p11), 512, %v1939_v9 }
 0x187   : >> { %v1415_v0 = vpop.f32.mrb[3].mxu0 }
 0x188   : >> { %v2670_v18 = vmov %v2394_v38  ;;  %v1416_v21 = vadd.f32 %v1415_v0, %v1414_v35  ;;  %vm774_vm15 = vcmp.eq.s32.totalorder (%p281_p11), %v759_v53, %v1930_v6  ;;  %vm811_vm0 = vcmp.eq.s32.totalorder (%p281_p11), %v759_v53, %v1944_v11 }
 0x189   : >> { %v2680_v38 = vmov %v2670_v18 }
 0x18a   : >> { %v2397_v37 = vadd.f32 %v2671_v22, %v1416_v21   ;;  %v1417_v60 = vpop.f32.mrb[0].mxu1  ;;  %v753_v38 = vadd.s32 (%p281_p11), 512, %v2682_v20  ;;  %v1340_v22 = vsel (%p281_p11), %vm774_vm15, 1.0, %v1817_v15 }
 0x18b   : >> { %v1418_v45 = vpop.f32.mrb[1].mxu1 }
 0x18c   : >> { %v2672_v59 = vmov %v2397_v37  ;;  %v1419_v62 = vadd.f32 %v1418_v45, %v1417_v60  ;;  %vm768_vm1 = vcmp.eq.s32.totalorder (%p281_p11), %v753_v38, %v1930_v6  ;;  %vm805_vm3 = vcmp.eq.s32.totalorder (%p281_p11), %v753_v38, %v1944_v11 }
 0x18d   : >> { %v2679_v37 = vmov %v2672_v59  ;;  %v1334_v23 = vsel (%p281_p11), %vm768_vm1, 1.0, %v1817_v15  ;;  %v1345_v25 = vsel (%p281_p11), %vm805_vm3, 1.0, %v1817_v15  ;;  %v1351_v60 = vsel (%p281_p11), %vm811_vm0, 1.0, %v1817_v15 }
 0x18e   : >> { %v2400_v36 = vadd.f32 %v2673_v63, %v1419_v62   ;;  %v1420_v47 = vpop.f32.mrb[2].mxu1  ;;  %v838_v29 = vsub.f32 (%p281_p11), %v1334_v23, %v1345_v25  ;;  %v1346_v37 = vsel (%p281_p11), %vm806_vm5, 1.0, %v1817_v15  ;;  %v745_v62 = vld [vmem:[%s2624_s3 + $0x220] sm:$0xff] (%p281_p11)  ;;  %vm988_vm1 = vcmp.eq.s32.totalorder (%p281_p11), %v2682_v20, %v2469_v42  ;;  %v750_v23 = vld [vmem:[%s2624_s3 + $0x248] sm:$0xff] (%p281_p11) }
 0x18f   : >> { %v1421_v51 = vpop.f32.mrb[3].mxu1  ;;  %283 = sbr.rel (!%p281_p11) target bundleno = 36 (0x24), region = 89  ;;  %v839_v48 = vsub.f32 (%p281_p11), %v1335_v28, %v1346_v37  ;;  %v1006_v63 = vld [vmem:[%s2625_s4 + $0x20] sm:$0xff] (%p281_p11)  ;;  %vm2505_vm2 = vmpackc.low (%p281_p11), %vm988_vm1, %vm987_vm14  ;;  %vm989_vm3 = vcmp.eq.s32.totalorder (%p281_p11), %v2683_v61, %v2469_v42  ;;  %852 = vxpose.xlu0.b32.cont [5/11] (short) (narrow) (%p281_p11), %v745_v62, 32  ;;  %vm1039_vm14 = vcmask (%p281_p11), 326656  }
 0x190   : >> { %v2674_v2 = vmov %v2400_v36  ;;  %v1422_v55 = vadd.f32 %v1421_v51, %v1420_v47  ;;  %v1523_v41 = vpack.c.bf16 (%p281_p11), %v838_v29, %v837_v26  ;;  %v844_v47 = vsub.f32 (%p281_p11), %v1340_v22, %v1351_v60  ;;  %1544 = vmatprep.subr.msk.bf16.mxu0 (%p281_p11), %vm2505_vm2, %v1818_v3  ;;  %vm2518_vm7 = vmpackc.low (%p281_p11), %vm990_vm4, %vm989_vm3  ;;  %1011 = vxpose.xlu1.b32.end [5/5] (short) (narrow) (%p281_p11), %v1006_v63, 32 }
 0x191   : >> { %v2678_v36 = vmov %v2674_v2  ;;  %v1527_v57 = vpack.c.bf16 (%p281_p11), %v840_v49, %v839_v48  ;;  %v760_v51 = vadd.s32 (%p281_p11), 512, %v1942_v10  ;;  %1546 = vmatpush3.bf16.msk.msra.mxu0 (%p281_p11), %vm2505_vm2, %v1818_v3 }
 0x192   : >> { %v2403_v35 = vadd.f32 %v2675_v17, %v1422_v55   ;;  %v758_v36 = vadd.s32 (%p281_p11), 512, %v1936_v8  ;;  %v1337_v8 = vsel (%p281_p11), %vm771_vm8, 1.0, %v1817_v15  ;;  %1524 = vmatprep.subr.bf16.mxu1 (%p281_p11), %v1523_v41  ;;  %v761_v17 = vadd.s32 (%p281_p11), 512, %v1947_v12  ;;  %1548 = vmatprep.subr.msk.bf16.mxu0 (%p281_p11), %vm2518_vm7, %v1818_v3 }
 0x193   : > { %v841_v52 = vsub.f32 (%p281_p11), %v1337_v8, %v1348_v43  ;;  %1526 = vmatpush3.bf16.msra.mxu1 (%p281_p11), %v1523_v41  ;;  %vm775_vm5 = vcmp.eq.s32.totalorder (%p281_p11), %v760_v51, %v1930_v6  ;;  %vm812_vm6 = vcmp.eq.s32.totalorder (%p281_p11), %v760_v51, %v1944_v11  ;;  %v762_v12 = vadd.s32 (%p281_p11), 512, %v1950_v13  ;;  %853 = vxpose.xlu0.b32.cont [6/11] (short) (narrow) (%p281_p11), %v746_v34, 32 }
 0x194   : >> { %v2676_v39 = vmov %v2403_v35  ;;  %vm773_vm12 = vcmp.eq.s32.totalorder (%p281_p11), %v758_v36, %v1930_v6  ;;  %vm810_vm13 = vcmp.eq.s32.totalorder (%p281_p11), %v758_v36, %v1944_v11  ;;  %1528 = vmatprep.subr.bf16.mxu1 (%p281_p11), %v1527_v57  ;;  %vm776_vm8 = vcmp.eq.s32.totalorder (%p281_p11), %v761_v17, %v1930_v6 }
 0x195   : >> { %v2677_v35 = vmov %v2676_v39  ;;  %v1339_v0 = vsel (%p281_p11), %vm773_vm12, 1.0, %v1817_v15  ;;  %v1350_v21 = vsel (%p281_p11), %vm810_vm13, 1.0, %v1817_v15  ;;  %v1341_v4 = vsel (%p281_p11), %vm775_vm5, 1.0, %v1817_v15  ;;  %1550 = vmatpush3.bf16.msk.msra.mxu0 (%p281_p11), %vm2518_vm7, %v1818_v3 }
 0x196   : > { %v842_v35 = vsub.f32 %v1338_v50, %v1349_v54  ;;  %v843_v45 = vsub.f32 %v1339_v0, %v1350_v21  ;;  %vm813_vm9 = vcmp.eq.s32.totalorder %v761_v17, %v1944_v11  ;;  %v1352_v46 = vsel %vm812_vm6, 1.0, %v1817_v15 }
 0x197   : > { %1530 = vmatpush3.bf16.msra.mxu1 %v1527_v57  ;;  %v1342_v20 = vsel %vm776_vm8, 1.0, %v1817_v15  ;;  %v1353_v13 = vsel %vm813_vm9, 1.0, %v1817_v15  ;;  %v845_v38 = vsub.f32 %v1341_v4, %v1352_v46  ;;  %vm777_vm10 = vcmp.eq.s32.totalorder %v762_v12, %v1930_v6  ;;  %v747_v6 = vld [vmem:[%s2624_s3 + $0x230] sm:$0xff] }
 0x198   : > { %v1531_v9 = vpack.c.bf16 %v842_v35, %v841_v52  ;;  %v1535_v19 = vpack.c.bf16 %v844_v47, %v843_v45  ;;  %v846_v61 = vsub.f32 %v1342_v20, %v1353_v13  ;;  %vm814_vm11 = vcmp.eq.s32.totalorder %v762_v12, %v1944_v11  ;;  %854 = vxpose.xlu0.b32.cont [7/11] (short) (narrow) %v747_v6, 32 }
 0x199   : > { %vm991_vm12 = vcmp.eq.s32.totalorder %v1924_v5, %v2469_v42  ;;  %v1343_v56 = vsel %vm777_vm10, 1.0, %v1817_v15  ;;  %v1354_v14 = vsel %vm814_vm11, 1.0, %v1817_v15  ;;  %v748_v5 = vld [vmem:[%s2624_s3 + $0x238] sm:$0xff]  ;;  %v749_v15 = vld [vmem:[%s2624_s3 + $0x240] sm:$0xff]  ;;  %vm880_vm13 = vcmask 719872  }
 0x19a   : > { %1532 = vmatprep.subr.bf16.mxu1 %v1531_v9  ;;  %v1539_v58 = vpack.c.bf16 %v846_v61, %v845_v38  ;;  %1483 = vmatprep.subr.msk.mxu0 %vm991_vm12, %v1819_v16  ;;  %v847_v11 = vsub.f32 %v1343_v56, %v1354_v14 }
 0x19b   : > { %1534 = vmatpush3.bf16.msra.mxu1 %v1531_v9  ;;  %1484 = vmatpush3.msk.msra.mxu0 %vm991_vm12, %v1819_v16 }
 0x19c   : > { %1536 = vmatprep.subr.bf16.mxu1 %v1535_v19  ;;  %855 = vxpose.xlu0.b32.cont [8/11] (short) (narrow) %v748_v5, 32 }
 0x19f   : > { %1538 = vmatpush3.bf16.msra.mxu1 %v1535_v19 }
 0x1a0   : > { %1540 = vmatprep.subr.bf16.mxu1 %v1539_v58  ;;  %856 = vxpose.xlu0.b32.cont [9/11] (short) (narrow) %v749_v15, 32 }
 0x1a3   : > { %1542 = vmatpush3.bf16.msra.mxu1 %v1539_v58 }
 0x1a4   : > { %1467 = vmatprep.subr.mxu1 %v847_v11  ;;  %857 = vxpose.xlu0.b32.cont [10/11] (short) (narrow) %v750_v23, 32 }
 0x1a7   : > { %1468 = vmatpush3.msra.mxu1 %v847_v11 }
 0x1a8   : > { %858 = vxpose.xlu0.b32.end [11/11] (short) (narrow) %v751_v24, 32 }
 0x200   : > { %v864_v25 = vpop.trf.xlu0  ;;  %v1023_v26 = vpop.trf.xlu1 }
 0x201   : > { %1469 = vmatprep.mubr.msk.f32.mxu1 %vm880_vm13, %v864_v25  ;;  %1485 = vmatprep.mubr.msk.f32.mxu0 %vm1039_vm14, %v1023_v26 }
 0x204   : > { %v865_v27 = vpop.trf.xlu0  ;;  %v1024_v28 = vpop.trf.xlu1 }
 0x205   : > { %1470 = vmatmul.mubr.msk.f32.vlgmr.msra.gmra.mrb[0].mxu1 %vm880_vm13, %v865_v27  ;;  %1486 = vmatmul.mubr.msk.f32.vlgmr.msra.gmra.mrb[0].mxu0 %vm1039_vm14, %v1024_v28 }
 0x208   : > { %v866_v29 = vpop.trf.xlu0  ;;  %v1025_v30 = vpop.trf.xlu1 }
 0x209   : > { %1472 = vmatprep.mubr.msk.f32.mxu1 %vm880_vm13, %v866_v29  ;;  %1488 = vmatprep.mubr.msk.f32.mxu0 %vm1039_vm14, %v1025_v30 }
 0x20c   : > { %v867_v31 = vpop.trf.xlu0  ;;  %v1026_v32 = vpop.trf.xlu1 }
 0x20d   : > { %1473 = vmatmul.mubr.msk.f32.gmra.mrb[2].mxu1 %vm880_vm13, %v867_v31  ;;  %1489 = vmatmul.mubr.msk.f32.gmra.mrb[2].mxu0 %vm1039_vm14, %v1026_v32 }
 0x2d8   : > { %v1471_v33 = vpop.f32.mrb[0].mxu1  ;;  %v1487_v37 = vpop.f32.mrb[0].mxu0 }
 0x2d9   : > { %v979_v36 = vadd.f32 %v1471_v33, %v2672_v59  ;;  %v959_v41 = vpop.f32.mrb[1].mxu1  ;;  %v1118_v40 = vpop.f32.mrb[1].mxu0 }
 0x2da   : > { %v978_v7 = vadd.f32 %v959_v41, %v2670_v18 }
 0x2db   : > { %v1138_v48 = vadd.f32 %v1487_v37, %v979_v36 }
 0x2dc   : > { %v1137_v49 = vadd.f32 %v1118_v40, %v978_v7 }
 0x2dd   : > { %v1142_v42 = vmul.f32 %v1138_v48, %v1138_v48 }
 0x2de   : > { %v1141_v8 = vmul.f32 %v1137_v49, %v1137_v49 }
 0x2e0   : > { %v1145_v50 = vadd.f32 %v1142_v42, %v1141_v8  ;;  %v1474_v43 = vpop.f32.mrb[2].mxu1  ;;  %v1490_v44 = vpop.f32.mrb[2].mxu0 }
 0x2e1   : > { %v981_v1 = vadd.f32 %v1474_v43, %v2676_v39  ;;  %v969_v57 = vpop.f32.mrb[3].mxu1  ;;  %v1128_v54 = vpop.f32.mrb[3].mxu0 }
 0x2e2   : > { %v980_v52 = vadd.f32 %v969_v57, %v2674_v2 }
 0x2e3   : > { %v1140_v59 = vadd.f32 %v1490_v44, %v981_v1 }
 0x2e4   : > { %v1139_v53 = vadd.f32 %v1128_v54, %v980_v52 }
 0x2e5   : > { %v1144_v0 = vmul.f32 %v1140_v59, %v1140_v59 }
 0x2e6   : > { %v1143_v35 = vmul.f32 %v1139_v53, %v1139_v53 }
 0x2e8   : > { %v1146_v18 = vadd.f32 %v1145_v50, %v1143_v35 }
 0x2ea   : > { %v1147_v21 = vadd.f32 %v1146_v18, %v1144_v0 }
 0x2ec   : > { %v1148_v9 = vrot.slane %v1147_v21, 4 }
 0x2ee   : > { %v1149_v22 = vadd.f32 %v1148_v9, %v1147_v21 }
 0x2f0   : > { %v1150_v60 = vrot.slane %v1149_v22, 2 }
 0x2f2   : > { %v1151_v45 = vadd.f32 %v1150_v60, %v1149_v22 }
 0x2f4   : > { %v1152_v62 = vrot.slane %v1151_v45, 1 }
 0x2f6   : > { %v1153_v39 = vadd.f32 %v1152_v62, %v1151_v45 }
 0x2f8   : > { %1710 = vrsqrt.f32 %v1153_v39  ;;  %vm1156_vm15 = vcmp.eq.f32.partialorder %v1153_v39, inf  ;;  %v1159_v47 = vand.u32 2147483648, %v1153_v39  ;;  %vm1158_vm0 = vcmp.eq.f32.partialorder %v1153_v39, 0.0 }
 0x302   : > { %v1711_v63 = vpop.eup %1710 }
 0x303   : > { %v1155_v2 = vmul.f32 %v1711_v63, %v1153_v39 }
 0x305   : > { %v1157_v51 = vsel %vm1156_vm15, %v1153_v39, %v1155_v2 }
 0x306   : > { %v1160_v55 = vsel %vm1158_vm0, %v1159_v47, %v1157_v51 }
 0x307   : > { %1161 = vst [vmem:[%s2017_s16] sm:$0x1] %v1160_v55 }
 0x308   : > { %1725 = shalt.err (!%p1722_p4)
}
 0x309   : > { %s1726_s30 = scalar_lea.hbm %s2576_s26, 16  ;;  %s1730_s13 = scalar_lea.hbm %s2626_s5, 48 }
 0x30a   : > { %p1727_p7 = scmp.ne.s32.totalorder %s2576_s26, %s1726_s30  ;;  %p1731_p10 = scmp.lt.u32.totalorder %s2576_s26, %s2626_s5 }
 0x30b   : > { %p1732_p11 = scmp.lt.u32.totalorder %s1730_s13, %s1726_s30  ;;  %p1734_p13 = scmp.lt.u32.totalorder %s1726_s30, %s2576_s26 }
 0x30c   : > { %p1728_p8 = pnand %p1727_p7, %p1889_p5 }
 0x30d   : > { %p1733_p12 = por %p1732_p11, %p1731_p10 }
 0x30e   : > { %p1729_p9 = pneg %p1728_p8 }
 0x30f   : > { %p1735_p0 = por %p1734_p13, %p1733_p12 }
 0x311   : > { %p1736_p1 = pnand %p1735_p0, %p1729_p9 }
 0x313   : > { %1739 = shalt.err (!%p1736_p1)
}
 0x314   : > { %1575 = dma.vmem_to_hbm [thread:$0]  (%p1889_p5), %s2578_s17, 16, %s2576_s26, %s1163_s22  }
 0x315 PF: > { %p1581_p2 = scmp.ge.s32.totalorder %s1794_s21, 2  ;;  %s1187_s12 = sand.u32 1, %s1782_s18  }
 0x316   : > { %s1188_s15 = scalar_lea.sflag [#allocation3], %s1187_s12 }
 0x317   : > { %p1578_p3 = pnand %p1581_p2, %p1893_p6 }
 0x319   : > { %1777 = dma.done.wait (!%p1578_p3), %s1188_s15, 16  }
 0x31a   : > { %1779 = vsyncadd (!%p1578_p3), %s1188_s15, 4294967280  ;;  %p15_p4 = scmp.ge.s32.totalorder %s1876_s24, 5   ;;  %s2688_s18 = smov %s1786_s19 }
 0x31b   : > { %s2689_s19 = smov %s1790_s20  ;;  %s2690_s20 = smov %s1887_s27 }
 0x31c   : > { %s2691_s21 = smov %s1876_s24  ;;  %17 = sbr.rel (!%p15_p4) target bundleno = 3 (0x3), region = 100 }
 0x323   :  { %1192 = vsyncpa [#allocation3], 1 }
 0x324   :  { %1194 = vsyncpa [#allocation3 + $0x1], 1 }

</bundles_post_ra>
